<compile_context>
chip_gen: v6e
topology: v6e:2x2x1
jax: 0.10.0
libtpu: 0.0.40
codegen_flags: <defaults>
</compile_context>

<pallas_src>
import jax
import jax.numpy as jnp
from jax.experimental import pallas as pl
from jax.experimental.pallas import tpu as pltpu


TB = 128  # rows per grid step: 16 MXU sublane-tiles of work, ~64 KiB/tile VMEM


# ------------------------------ helpers ------------------------------------

def _pad_ids(node_ids, tb):
    B = node_ids.shape[0]
    Bp = ((B + tb - 1) // tb) * tb
    if Bp != B:
        node_ids = jnp.pad(node_ids, (0, Bp - B))  # pad with id 0 (harmless reads)
    return node_ids, B, Bp


def prepare_gru_params(w_ih, w_hh, b_ih, b_hh):
    """Host-side, one-time split of GRUCell parameters for the kernel."""
    D = w_ih.shape[0]
    return {
        "w_xrz": w_ih[:, :2 * D],                    # (D, 2D)
        "w_hrz": w_hh[:, :2 * D],                    # (D, 2D)
        "w_xn": w_ih[:, 2 * D:],                     # (D, D)
        "w_hn": w_hh[:, 2 * D:],                     # (D, D)
        "b_rz": b_ih[:, :2 * D] + b_hh[:, :2 * D],   # (1, 2D) pre-summed
        "b_nx": b_ih[:, 2 * D:],                     # (1, D)
        "b_nh": b_hh[:, 2 * D:],                     # (1, D)
    }


# --------------------------- forward: batched gather ------------------------

def _make_gather_kernel(tb):
    def kernel(ids_ref, mem_hbm, out_ref, sem):
        base = pl.program_id(0) * tb

        # DMA selected rows straight into the pipelined VMEM output block
        # (no scratch round trip); one shared DMA semaphore for all rows.
        @pl.loop(0, tb)
        def _(t):
            nid = ids_ref[base + t]
            pltpu.make_async_copy(mem_hbm.at[pl.ds(nid, 1)],
                                  out_ref.at[pl.ds(t, 1)],
                                  sem.at[0]).start()

        @pl.loop(0, tb)
        def _(t):
            pltpu.make_async_copy(mem_hbm.at[pl.ds(0, 1)],
                                  out_ref.at[pl.ds(t, 1)],
                                  sem.at[0]).wait()
    return kernel


def tgn_forward(memory, node_ids, *, tb=TB):
    """Equivalent of TGNMemory.forward: memory[node_ids]."""
    N, D = memory.shape
    ids, B, Bp = _pad_ids(node_ids.astype(jnp.int32), tb)
    out = pl.pallas_call(
        _make_gather_kernel(tb),
        out_shape=jax.ShapeDtypeStruct((Bp, D), memory.dtype),
        grid_spec=pltpu.PrefetchScalarGridSpec(
            num_scalar_prefetch=1,
            grid=(Bp // tb,),
            in_specs=[pl.BlockSpec(memory_space=pl.ANY)],          # memory stays in HBM
            out_specs=pl.BlockSpec((tb, D), lambda i, ids: (i, 0)),
            scratch_shapes=[pltpu.SemaphoreType.DMA((1,))],
        ),
        # disjoint output tiles per step -> safe to split across v7x's 2 TCs
        compiler_params=pltpu.CompilerParams(dimension_semantics=("parallel",)),
    )(ids, memory)
    return out[:B]


# ------------------ update: pipelined gather -> GRU -> scatter ---------------

def _make_update_kernel(tb, d, nsteps, last_valid):
    has_partial = last_valid != tb

    def kernel(ids_ref, mem_hbm, msg_ref,
               w_xrz_ref, w_hrz_ref, w_xn_ref, w_hn_ref,
               b_rz_ref, b_nx_ref, b_nh_ref,
               mem_out_hbm,
               rows, newrows, in_sems, out_sems):
        pid = pl.program_id(0)
        slot = pid % 2
        nxt = 1 - slot
        base = pid * tb
        s_off = pl.multiple_of(slot * tb, tb)   # this step's buffer offset
        n_off = pl.multiple_of(nxt * tb, tb)    # other slot's buffer offset

        # ---- DMA helpers: one shared DMA semaphore per slot per direction ----
        def start_gather(step, off, sem):
            b0 = step * tb

            @pl.loop(0, tb)
            def _(t):
                nid = ids_ref[b0 + t]
                pltpu.make_async_copy(mem_hbm.at[pl.ds(nid, 1)],
                                      rows.at[pl.ds(off + t, 1)],
                                      sem).start()

        def wait_gather(off, sem):
            @pl.loop(0, tb)
            def _(t):
                pltpu.make_async_copy(mem_hbm.at[pl.ds(0, 1)],
                                      rows.at[pl.ds(off + t, 1)],
                                      sem).wait()

        def start_scatter(off, sem, n_rows):
            @pl.loop(0, n_rows)
            def _(t):
                nid = ids_ref[base + t]
                pltpu.make_async_copy(newrows.at[pl.ds(off + t, 1)],
                                      mem_out_hbm.at[pl.ds(nid, 1)],
                                      sem).start()

        def wait_scatter(off, sem, n_rows):
            @pl.loop(0, n_rows)
            def _(t):
                pltpu.make_async_copy(newrows.at[pl.ds(off + t, 1)],
                                      mem_out_hbm.at[pl.ds(0, 1)],
                                      sem).wait()

        # --- prime the very first gather ---
        @pl.when(pid == 0)
        def _():
            start_gather(0, s_off, in_sems.at[slot])

        # --- prefetch NEXT step's rows (ids read from SMEM before any wait) ---
        if nsteps > 1:
            @pl.when(pid < nsteps - 1)
            def _():
                start_gather(pid + 1, n_off, in_sems.at[nxt])

        # --- wait for this step's gathered previous-memory rows ---
        wait_gather(s_off, in_sems.at[slot])

        # --- before reusing newrows[slot], drain the scatter issued 2 steps ago
        if nsteps > 2:
            @pl.when(pid >= 2)
            def _():
                wait_scatter(s_off, out_sems.at[slot], tb)

        # ----------------- GRUCell (torch gate order [r | z | n]) -------------
        x = msg_ref[...]                          # (tb, D)
        h = rows[pl.ds(s_off, tb), :]             # (tb, D) previous memory
        rz = (jnp.dot(x, w_xrz_ref[...], preferred_element_type=jnp.float32)
              + jnp.dot(h, w_hrz_ref[...], preferred_element_type=jnp.float32)
              + b_rz_ref[...])
        r = jax.nn.sigmoid(rz[:, :d])
        z = jax.nn.sigmoid(rz[:, d:])
        nx = jnp.dot(x, w_xn_ref[...], preferred_element_type=jnp.float32) + b_nx_ref[...]
        nh = jnp.dot(h, w_hn_ref[...], preferred_element_type=jnp.float32) + b_nh_ref[...]
        n = jnp.tanh(nx + r * nh)
        newrows[pl.ds(s_off, tb), :] = ((1.0 - z) * n + z * h).astype(newrows.dtype)

        # --- scatter updated rows into the aliased HBM table (waits deferred) --
        # Only the final step can be partial; it gets a statically-sized
        # partial scatter, all other steps stay branch-free full tiles.
        if has_partial:
            if nsteps > 1:
                @pl.when(pid < nsteps - 1)
                def _():
                    start_scatter(s_off, out_sems.at[slot], tb)

            @pl.when(pid == nsteps - 1)
            def _():
                start_scatter(s_off, out_sems.at[slot], last_valid)
        else:
            start_scatter(s_off, out_sems.at[slot], tb)

        # --- final step: drain every scatter still in flight -------------------
        @pl.when(pid == nsteps - 1)
        def _():
            if nsteps > 1:
                wait_scatter(n_off, out_sems.at[nxt], tb)        # step nsteps-2
            wait_scatter(s_off, out_sems.at[slot], last_valid)   # this step

    return kernel


def tgn_update(memory, last_update, node_ids, messages, timestamps,
               fused_params, *, tb=TB):
    """Equivalent of TGNMemory.update; memory table updated in place (aliased)."""
    N, D = memory.shape
    ids, B, Bp = _pad_ids(node_ids.astype(jnp.int32), tb)
    if Bp != B:
        messages = jnp.pad(messages, ((0, Bp - B), (0, 0)))
    nsteps = Bp // tb
    last_valid = B - (nsteps - 1) * tb   # valid rows in the final grid step

    new_memory = pl.pallas_call(
        _make_update_kernel(tb, D, nsteps, last_valid),
        out_shape=jax.ShapeDtypeStruct((N, D), memory.dtype),
        grid_spec=pltpu.PrefetchScalarGridSpec(
            num_scalar_prefetch=1,
            grid=(nsteps,),
            in_specs=[
                pl.BlockSpec(memory_space=pl.ANY),                # memory (aliased)
                pl.BlockSpec((tb, D), lambda i, ids: (i, 0)),     # messages tile
                pl.BlockSpec((D, 2 * D), lambda i, ids: (0, 0)),  # w_xrz
                pl.BlockSpec((D, 2 * D), lambda i, ids: (0, 0)),  # w_hrz
                pl.BlockSpec((D, D), lambda i, ids: (0, 0)),      # w_xn
                pl.BlockSpec((D, D), lambda i, ids: (0, 0)),      # w_hn
                pl.BlockSpec((1, 2 * D), lambda i, ids: (0, 0)),  # b_rz
                pl.BlockSpec((1, D), lambda i, ids: (0, 0)),      # b_nx
                pl.BlockSpec((1, D), lambda i, ids: (0, 0)),      # b_nh
            ],
            out_specs=pl.BlockSpec(memory_space=pl.ANY),
            scratch_shapes=[
                pltpu.VMEM((2 * tb, D), memory.dtype),   # gathered prev rows, 2 slots
                pltpu.VMEM((2 * tb, D), memory.dtype),   # updated rows, 2 slots
                pltpu.SemaphoreType.DMA((2,)),           # gather sems (per slot)
                pltpu.SemaphoreType.DMA((2,)),           # scatter sems (per slot)
            ],
        ),
        # flat inputs: node_ids(0), memory(1), ... -> alias memory to output 0
        input_output_aliases={1: 0},
        # cross-step manual double-buffering => grid must stay sequential
        compiler_params=pltpu.CompilerParams(dimension_semantics=("arbitrary",)),
    )(ids, memory, messages,
      fused_params["w_xrz"], fused_params["w_hrz"],
      fused_params["w_xn"], fused_params["w_hn"],
      fused_params["b_rz"], fused_params["b_nx"], fused_params["b_nh"])

    # O(N) 1-D glue; in-place via jit donation of last_update.
    new_last_update = last_update.at[node_ids].set(
        timestamps.astype(last_update.dtype))
    return new_memory, new_last_update


# Donate memory/last_update so XLA updates them in place (no full-table copy).
tgn_update_jit = jax.jit(tgn_update, donate_argnums=(0, 1))
tgn_forward_jit = jax.jit(tgn_forward)


# ----------------------------- reference (pure JAX) -------------------------

def _ref_gru(x, h, w_ih, w_hh, b_ih, b_hh):
    D = h.shape[-1]
    hp = jax.lax.Precision.HIGHEST
    gi = jnp.dot(x, w_ih, precision=hp) + b_ih
    gh = jnp.dot(h, w_hh, precision=hp) + b_hh
    r = jax.nn.sigmoid(gi[:, :D] + gh[:, :D])
    z = jax.nn.sigmoid(gi[:, D:2 * D] + gh[:, D:2 * D])
    n = jnp.tanh(gi[:, 2 * D:] + r * gh[:, 2 * D:])
    return (1.0 - z) * n + z * h


# --------------------------------- main -------------------------------------

if __name__ == "__main__":
    num_nodes = 512
    memory_dim = 128   # lane-aligned
    batch = 300        # -> 3 grid steps at TB=128, last step partial (44 rows)

    key = jax.random.PRNGKey(0)
    k1, k2, k3, k4, k5, k6, k7, k8, k9 = jax.random.split(key, 9)

    # Module state (zeros, as in __init__).
    memory = jnp.zeros((num_nodes, memory_dim), jnp.float32)
    last_update = jnp.zeros((num_nodes,), jnp.float32)

    # GRUCell parameters (torch layout transposed for row-major matmul).
    scale = 1.0 / jnp.sqrt(memory_dim)
    w_ih = jax.random.uniform(k1, (memory_dim, 3 * memory_dim), jnp.float32, -scale, scale)
    w_hh = jax.random.uniform(k2, (memory_dim, 3 * memory_dim), jnp.float32, -scale, scale)
    b_ih = jax.random.uniform(k3, (1, 3 * memory_dim), jnp.float32, -scale, scale)
    b_hh = jax.random.uniform(k4, (1, 3 * memory_dim), jnp.float32, -scale, scale)
    fused_params = prepare_gru_params(w_ih, w_hh, b_ih, b_hh)

    # Two update rounds; ids are distinct within each batch (duplicate-id
    # behavior is unspecified in the reference module too).
    ids1 = jax.random.permutation(k5, num_nodes)[:batch].astype(jnp.int32)
    msg1 = jax.random.normal(k6, (batch, memory_dim), jnp.float32)
    ts1 = jax.random.uniform(k7, (batch,), jnp.float32, 0.0, 100.0)
    ids2 = jax.random.permutation(k8, num_nodes)[:batch].astype(jnp.int32)
    msg2 = jax.random.normal(k9, (batch, memory_dim), jnp.float32)
    ts2 = ts1 + 100.0

    # Fused updates (gather -> GRU -> in-place scatter), then forward gather.
    memory, last_update = tgn_update_jit(memory, last_update, ids1, msg1, ts1, fused_params)
    memory, last_update = tgn_update_jit(memory, last_update, ids2, msg2, ts2, fused_params)
    out = tgn_forward_jit(memory, ids2)
    out = jax.block_until_ready(out)

    # Pure-JAX reference of the same semantics.
    mem_ref = jnp.zeros((num_nodes, memory_dim), jnp.float32)
    lu_ref = jnp.zeros((num_nodes,), jnp.float32)
    for nids, msg, ts in ((ids1, msg1, ts1), (ids2, msg2, ts2)):
        upd = _ref_gru(msg, mem_ref[nids], w_ih, w_hh, b_ih, b_hh)
        mem_ref = mem_ref.at[nids].set(upd)
        lu_ref = lu_ref.at[nids].set(ts)
    fwd_ref = mem_ref[ids2]

    assert out.shape == (batch, memory_dim)
    assert jnp.allclose(out, fwd_ref, atol=1e-3, rtol=1e-3), "forward mismatch"
    assert jnp.allclose(memory, mem_ref, atol=1e-3, rtol=1e-3), "memory table mismatch"
    assert jnp.allclose(last_update, lu_ref, atol=1e-6), "last_update mismatch"

    print("KERNEL_OK")
</pallas_src>

<mosaic_0001>
module attributes {stable_mosaic.version = 11 : i64} {
  func.func @kernel(%arg0: i32, %arg1: memref<384xi32, #tpu.memory_space<smem>>, %arg2: memref<512x128xf32, #tpu.memory_space<any>>, %arg3: memref<128x128xf32, #tpu.memory_space<vmem>>, %arg4: memref<128x256xf32, #tpu.memory_space<vmem>>, %arg5: memref<128x256xf32, #tpu.memory_space<vmem>>, %arg6: memref<128x128xf32, #tpu.memory_space<vmem>>, %arg7: memref<128x128xf32, #tpu.memory_space<vmem>>, %arg8: memref<1x256xf32, #tpu.memory_space<vmem>>, %arg9: memref<1x128xf32, #tpu.memory_space<vmem>>, %arg10: memref<1x128xf32, #tpu.memory_space<vmem>>, %arg11: memref<512x128xf32, #tpu.memory_space<any>>, %arg12: memref<256x128xf32, #tpu.memory_space<vmem>>, %arg13: memref<256x128xf32, #tpu.memory_space<vmem>>, %arg14: memref<2x!tpu.dma_semaphore, #tpu.memory_space<semaphore_mem>>, %arg15: memref<2x!tpu.dma_semaphore, #tpu.memory_space<semaphore_mem>>) attributes {dimension_semantics = [#tpu.dimension_semantics<arbitrary>], iteration_bounds = array<i64: 3>, scalar_prefetch = 1 : i64, scratch_operands = 4 : i64, tpu.core_type = #tpu.core_type<tc>, window_params = [{}, {transform_indices = @transform_1, window_bounds = array<i64: 128, 128>}, {pipeline_mode = #tpu.pipeline_mode<synchronous>, transform_indices = @transform_2, window_bounds = array<i64: 128, 256>}, {pipeline_mode = #tpu.pipeline_mode<synchronous>, transform_indices = @transform_3, window_bounds = array<i64: 128, 256>}, {pipeline_mode = #tpu.pipeline_mode<synchronous>, transform_indices = @transform_4, window_bounds = array<i64: 128, 128>}, {pipeline_mode = #tpu.pipeline_mode<synchronous>, transform_indices = @transform_5, window_bounds = array<i64: 128, 128>}, {pipeline_mode = #tpu.pipeline_mode<synchronous>, transform_indices = @transform_6, window_bounds = array<i64: 1, 256>}, {pipeline_mode = #tpu.pipeline_mode<synchronous>, transform_indices = @transform_7, window_bounds = array<i64: 1, 128>}, {pipeline_mode = #tpu.pipeline_mode<synchronous>, transform_indices = @transform_8, window_bounds = array<i64: 1, 128>}, {}]} {
    %c2_i32 = arith.constant 2 : i32
    %c0_i32 = arith.constant 0 : i32
    %0 = arith.cmpi eq, %c2_i32, %c0_i32 : i32
    %c1_i32 = arith.constant 1 : i32
    %1 = arith.select %0, %c1_i32, %c2_i32 : i32
    %2 = arith.remsi %arg0, %1 : i32
    %c0_i32_0 = arith.constant 0 : i32
    %3 = arith.cmpi ne, %2, %c0_i32_0 : i32
    %c0_i32_1 = arith.constant 0 : i32
    %4 = arith.cmpi slt, %2, %c0_i32_1 : i32
    %c0_i32_2 = arith.constant 0 : i32
    %5 = arith.cmpi slt, %1, %c0_i32_2 : i32
    %6 = arith.xori %4, %5 : i1
    %7 = arith.andi %6, %3 : i1
    %8 = arith.addi %2, %1 : i32
    %9 = arith.select %7, %8, %2 : i32
    %c1_i32_3 = arith.constant 1 : i32
    %10 = arith.subi %c1_i32_3, %9 : i32
    %c128_i32 = arith.constant 128 : i32
    %11 = arith.muli %arg0, %c128_i32 : i32
    %c128_i32_4 = arith.constant 128 : i32
    %12 = arith.muli %9, %c128_i32_4 : i32
    %13 = tpu.assume_multiple %12, 128 : i32
    %c128_i32_5 = arith.constant 128 : i32
    %14 = arith.muli %10, %c128_i32_5 : i32
    %15 = tpu.assume_multiple %14, 128 : i32
    %c0_i32_6 = arith.constant 0 : i32
    %16 = arith.cmpi eq, %arg0, %c0_i32_6 : i32
    %17 = arith.extui %16 : i1 to i32
    %c0_i32_7 = arith.constant 0 : i32
    %18 = arith.cmpi ne, %17, %c0_i32_7 : i32
    scf.if %18 {
      %c0_i32_45 = arith.constant 0 : i32
      %c128_i32_46 = arith.constant 128 : i32
      %78 = arith.addi %c0_i32_45, %c128_i32_46 : i32
      %c1_i32_47 = arith.constant 1 : i32
      scf.for %arg16 = %c0_i32_45 to %78 step %c1_i32_47  : i32 {
        %c1_i32_49 = arith.constant 1 : i32
        %79 = arith.muli %arg16, %c1_i32_49 : i32
        %c0_i32_50 = arith.constant 0 : i32
        %80 = arith.addi %c0_i32_50, %79 : i32
        %c0_i32_51 = arith.constant 0 : i32
        %81 = arith.addi %c0_i32_51, %80 : i32
        %82 = arith.index_cast %81 : i32 to index
        %83 = memref.load %arg1[%82] : memref<384xi32, #tpu.memory_space<smem>>
        %84 = arith.addi %13, %80 : i32
        %c0_i32_52 = arith.constant 0 : i32
        %85 = tpu.memref_slice %arg2[%83, %c0_i32_52] : memref<512x128xf32, #tpu.memory_space<any>> -> memref<1x128xf32, #tpu.memory_space<any>>
        %c0_i32_53 = arith.constant 0 : i32
        %86 = tpu.memref_slice %arg12[%84, %c0_i32_53] : memref<256x128xf32, #tpu.memory_space<vmem>> -> memref<1x128xf32, #tpu.memory_space<vmem>>
        %87 = tpu.memref_slice %arg14[%9] : memref<2x!tpu.dma_semaphore, #tpu.memory_space<semaphore_mem>> -> memref<1x!tpu.dma_semaphore, #tpu.memory_space<semaphore_mem>>
        %88 = tpu.memref_squeeze %87 : memref<1x!tpu.dma_semaphore, #tpu.memory_space<semaphore_mem>> -> memref<!tpu.dma_semaphore, #tpu.memory_space<semaphore_mem>>
        tpu.enqueue_dma source(%85 : memref<1x128xf32, #tpu.memory_space<any>>) target(%86 : memref<1x128xf32, #tpu.memory_space<vmem>>) target_semaphore(%88 : memref<!tpu.dma_semaphore, #tpu.memory_space<semaphore_mem>>)
      }
      %c128_i32_48 = arith.constant 128 : i32
    } else {
    }
    %c2_i32_8 = arith.constant 2 : i32
    %19 = arith.cmpi slt, %arg0, %c2_i32_8 : i32
    %20 = arith.extui %19 : i1 to i32
    %c0_i32_9 = arith.constant 0 : i32
    %21 = arith.cmpi ne, %20, %c0_i32_9 : i32
    scf.if %21 {
      %c1_i32_45 = arith.constant 1 : i32
      %78 = arith.addi %arg0, %c1_i32_45 : i32
      %c128_i32_46 = arith.constant 128 : i32
      %79 = arith.muli %78, %c128_i32_46 : i32
      %c0_i32_47 = arith.constant 0 : i32
      %c128_i32_48 = arith.constant 128 : i32
      %80 = arith.addi %c0_i32_47, %c128_i32_48 : i32
      %c1_i32_49 = arith.constant 1 : i32
      scf.for %arg16 = %c0_i32_47 to %80 step %c1_i32_49  : i32 {
        %c1_i32_51 = arith.constant 1 : i32
        %81 = arith.muli %arg16, %c1_i32_51 : i32
        %c0_i32_52 = arith.constant 0 : i32
        %82 = arith.addi %c0_i32_52, %81 : i32
        %83 = arith.addi %79, %82 : i32
        %84 = arith.index_cast %83 : i32 to index
        %85 = memref.load %arg1[%84] : memref<384xi32, #tpu.memory_space<smem>>
        %86 = arith.addi %15, %82 : i32
        %c0_i32_53 = arith.constant 0 : i32
        %87 = tpu.memref_slice %arg2[%85, %c0_i32_53] : memref<512x128xf32, #tpu.memory_space<any>> -> memref<1x128xf32, #tpu.memory_space<any>>
        %c0_i32_54 = arith.constant 0 : i32
        %88 = tpu.memref_slice %arg12[%86, %c0_i32_54] : memref<256x128xf32, #tpu.memory_space<vmem>> -> memref<1x128xf32, #tpu.memory_space<vmem>>
        %89 = tpu.memref_slice %arg14[%10] : memref<2x!tpu.dma_semaphore, #tpu.memory_space<semaphore_mem>> -> memref<1x!tpu.dma_semaphore, #tpu.memory_space<semaphore_mem>>
        %90 = tpu.memref_squeeze %89 : memref<1x!tpu.dma_semaphore, #tpu.memory_space<semaphore_mem>> -> memref<!tpu.dma_semaphore, #tpu.memory_space<semaphore_mem>>
        tpu.enqueue_dma source(%87 : memref<1x128xf32, #tpu.memory_space<any>>) target(%88 : memref<1x128xf32, #tpu.memory_space<vmem>>) target_semaphore(%90 : memref<!tpu.dma_semaphore, #tpu.memory_space<semaphore_mem>>)
      }
      %c128_i32_50 = arith.constant 128 : i32
    } else {
    }
    %c0_i32_10 = arith.constant 0 : i32
    %c128_i32_11 = arith.constant 128 : i32
    %22 = arith.addi %c0_i32_10, %c128_i32_11 : i32
    %c1_i32_12 = arith.constant 1 : i32
    scf.for %arg16 = %c0_i32_10 to %22 step %c1_i32_12  : i32 {
      %c1_i32_45 = arith.constant 1 : i32
      %78 = arith.muli %arg16, %c1_i32_45 : i32
      %c0_i32_46 = arith.constant 0 : i32
      %79 = arith.addi %c0_i32_46, %78 : i32
      %80 = arith.addi %13, %79 : i32
      %c0_i32_47 = arith.constant 0 : i32
      %c0_i32_48 = arith.constant 0 : i32
      %81 = tpu.memref_slice %arg2[%c0_i32_47, %c0_i32_48] : memref<512x128xf32, #tpu.memory_space<any>> -> memref<1x128xf32, #tpu.memory_space<any>>
      %c0_i32_49 = arith.constant 0 : i32
      %82 = tpu.memref_slice %arg12[%80, %c0_i32_49] : memref<256x128xf32, #tpu.memory_space<vmem>> -> memref<1x128xf32, #tpu.memory_space<vmem>>
      %83 = tpu.memref_slice %arg14[%9] : memref<2x!tpu.dma_semaphore, #tpu.memory_space<semaphore_mem>> -> memref<1x!tpu.dma_semaphore, #tpu.memory_space<semaphore_mem>>
      %84 = tpu.memref_squeeze %83 : memref<1x!tpu.dma_semaphore, #tpu.memory_space<semaphore_mem>> -> memref<!tpu.dma_semaphore, #tpu.memory_space<semaphore_mem>>
      tpu.wait_dma2 semaphore(%84 : memref<!tpu.dma_semaphore, #tpu.memory_space<semaphore_mem>>) src(%81 : memref<1x128xf32, #tpu.memory_space<any>>) dst(%82 : memref<1x128xf32, #tpu.memory_space<vmem>>)
    }
    %c128_i32_13 = arith.constant 128 : i32
    %c2_i32_14 = arith.constant 2 : i32
    %23 = arith.cmpi sge, %arg0, %c2_i32_14 : i32
    %24 = arith.extui %23 : i1 to i32
    %c0_i32_15 = arith.constant 0 : i32
    %25 = arith.cmpi ne, %24, %c0_i32_15 : i32
    scf.if %25 {
      %c0_i32_45 = arith.constant 0 : i32
      %c128_i32_46 = arith.constant 128 : i32
      %78 = arith.addi %c0_i32_45, %c128_i32_46 : i32
      %c1_i32_47 = arith.constant 1 : i32
      scf.for %arg16 = %c0_i32_45 to %78 step %c1_i32_47  : i32 {
        %c1_i32_49 = arith.constant 1 : i32
        %79 = arith.muli %arg16, %c1_i32_49 : i32
        %c0_i32_50 = arith.constant 0 : i32
        %80 = arith.addi %c0_i32_50, %79 : i32
        %81 = arith.addi %13, %80 : i32
        %c0_i32_51 = arith.constant 0 : i32
        %82 = tpu.memref_slice %arg13[%81, %c0_i32_51] : memref<256x128xf32, #tpu.memory_space<vmem>> -> memref<1x128xf32, #tpu.memory_space<vmem>>
        %c0_i32_52 = arith.constant 0 : i32
        %c0_i32_53 = arith.constant 0 : i32
        %83 = tpu.memref_slice %arg11[%c0_i32_52, %c0_i32_53] : memref<512x128xf32, #tpu.memory_space<any>> -> memref<1x128xf32, #tpu.memory_space<any>>
        %84 = tpu.memref_slice %arg15[%9] : memref<2x!tpu.dma_semaphore, #tpu.memory_space<semaphore_mem>> -> memref<1x!tpu.dma_semaphore, #tpu.memory_space<semaphore_mem>>
        %85 = tpu.memref_squeeze %84 : memref<1x!tpu.dma_semaphore, #tpu.memory_space<semaphore_mem>> -> memref<!tpu.dma_semaphore, #tpu.memory_space<semaphore_mem>>
        tpu.wait_dma2 semaphore(%85 : memref<!tpu.dma_semaphore, #tpu.memory_space<semaphore_mem>>) src(%82 : memref<1x128xf32, #tpu.memory_space<vmem>>) dst(%83 : memref<1x128xf32, #tpu.memory_space<any>>)
      }
      %c128_i32_48 = arith.constant 128 : i32
    } else {
    }
    %c0 = arith.constant 0 : index
    %c0_16 = arith.constant 0 : index
    %26 = vector.load %arg3[%c0, %c0_16] : memref<128x128xf32, #tpu.memory_space<vmem>>, vector<128x128xf32>
    %27 = arith.index_cast %13 : i32 to index
    %c0_17 = arith.constant 0 : index
    %28 = vector.load %arg12[%27, %c0_17] : memref<256x128xf32, #tpu.memory_space<vmem>>, vector<128x128xf32>
    %c0_18 = arith.constant 0 : index
    %c0_19 = arith.constant 0 : index
    %29 = vector.load %arg4[%c0_18, %c0_19] : memref<128x256xf32, #tpu.memory_space<vmem>>, vector<128x256xf32>
    %cst = arith.constant dense<0.000000e+00> : vector<128x256xf32>
    %30 = tpu.matmul %26, %29, %cst {dimension_numbers = #tpu.dot_dimension_numbers<[1], [0], [0], [1], [0, 0, 1, 1], [], []>} : vector<128x128xf32>, vector<128x256xf32>, vector<128x256xf32> -> vector<128x256xf32>
    %c0_20 = arith.constant 0 : index
    %c0_21 = arith.constant 0 : index
    %31 = vector.load %arg5[%c0_20, %c0_21] : memref<128x256xf32, #tpu.memory_space<vmem>>, vector<128x256xf32>
    %cst_22 = arith.constant dense<0.000000e+00> : vector<128x256xf32>
    %32 = tpu.matmul %28, %31, %cst_22 {dimension_numbers = #tpu.dot_dimension_numbers<[1], [0], [0], [1], [0, 0, 1, 1], [], []>} : vector<128x128xf32>, vector<128x256xf32>, vector<128x256xf32> -> vector<128x256xf32>
    %33 = arith.addf %30, %32 : vector<128x256xf32>
    %c0_23 = arith.constant 0 : index
    %c0_24 = arith.constant 0 : index
    %34 = vector.load %arg8[%c0_23, %c0_24] : memref<1x256xf32, #tpu.memory_space<vmem>>, vector<1x256xf32>
    %35 = vector.broadcast %34 : vector<1x256xf32> to vector<128x256xf32>
    %36 = arith.addf %33, %35 : vector<128x256xf32>
    %37 = vector.extract_strided_slice %36 {offsets = [0, 0], sizes = [128, 128], strides = [1, 1]} : vector<128x256xf32> to vector<128x128xf32>
    %38 = arith.negf %37 : vector<128x128xf32>
    %39 = math.exp %38 : vector<128x128xf32>
    %cst_25 = arith.constant 1.000000e+00 : f32
    %40 = vector.broadcast %cst_25 : f32 to vector<128x128xf32>
    %41 = arith.addf %40, %39 : vector<128x128xf32>
    %42 = arith.divf %40, %41 : vector<128x128xf32>
    %43 = vector.extract_strided_slice %36 {offsets = [0, 128], sizes = [128, 128], strides = [1, 1]} : vector<128x256xf32> to vector<128x128xf32>
    %44 = arith.negf %43 : vector<128x128xf32>
    %45 = math.exp %44 : vector<128x128xf32>
    %cst_26 = arith.constant 1.000000e+00 : f32
    %46 = vector.broadcast %cst_26 : f32 to vector<128x128xf32>
    %47 = arith.addf %46, %45 : vector<128x128xf32>
    %48 = arith.divf %46, %47 : vector<128x128xf32>
    %c0_27 = arith.constant 0 : index
    %c0_28 = arith.constant 0 : index
    %49 = vector.load %arg6[%c0_27, %c0_28] : memref<128x128xf32, #tpu.memory_space<vmem>>, vector<128x128xf32>
    %cst_29 = arith.constant dense<0.000000e+00> : vector<128x128xf32>
    %50 = tpu.matmul %26, %49, %cst_29 {dimension_numbers = #tpu.dot_dimension_numbers<[1], [0], [0], [1], [0, 0, 1, 1], [], []>} : vector<128x128xf32>, vector<128x128xf32>, vector<128x128xf32> -> vector<128x128xf32>
    %c0_30 = arith.constant 0 : index
    %c0_31 = arith.constant 0 : index
    %51 = vector.load %arg9[%c0_30, %c0_31] : memref<1x128xf32, #tpu.memory_space<vmem>>, vector<1x128xf32>
    %52 = vector.broadcast %51 : vector<1x128xf32> to vector<128x128xf32>
    %53 = arith.addf %50, %52 : vector<128x128xf32>
    %c0_32 = arith.constant 0 : index
    %c0_33 = arith.constant 0 : index
    %54 = vector.load %arg7[%c0_32, %c0_33] : memref<128x128xf32, #tpu.memory_space<vmem>>, vector<128x128xf32>
    %cst_34 = arith.constant dense<0.000000e+00> : vector<128x128xf32>
    %55 = tpu.matmul %28, %54, %cst_34 {dimension_numbers = #tpu.dot_dimension_numbers<[1], [0], [0], [1], [0, 0, 1, 1], [], []>} : vector<128x128xf32>, vector<128x128xf32>, vector<128x128xf32> -> vector<128x128xf32>
    %c0_35 = arith.constant 0 : index
    %c0_36 = arith.constant 0 : index
    %56 = vector.load %arg10[%c0_35, %c0_36] : memref<1x128xf32, #tpu.memory_space<vmem>>, vector<1x128xf32>
    %57 = vector.broadcast %56 : vector<1x128xf32> to vector<128x128xf32>
    %58 = arith.addf %55, %57 : vector<128x128xf32>
    %59 = arith.mulf %42, %58 : vector<128x128xf32>
    %60 = arith.addf %53, %59 : vector<128x128xf32>
    %61 = math.tanh %60 : vector<128x128xf32>
    %cst_37 = arith.constant 1.000000e+00 : f32
    %62 = vector.broadcast %cst_37 : f32 to vector<128x128xf32>
    %63 = arith.subf %62, %48 : vector<128x128xf32>
    %64 = arith.mulf %63, %61 : vector<128x128xf32>
    %65 = arith.mulf %48, %28 : vector<128x128xf32>
    %66 = arith.addf %64, %65 : vector<128x128xf32>
    %67 = arith.index_cast %13 : i32 to index
    %c0_38 = arith.constant 0 : index
    %68 = vector.load %arg13[%67, %c0_38] : memref<256x128xf32, #tpu.memory_space<vmem>>, vector<128x128xf32>
    tpu.vector_store %arg13[%67, %c0_38], %66 {strides = array<i32>} : memref<256x128xf32, #tpu.memory_space<vmem>>, vector<128x128xf32>,
    %c2_i32_39 = arith.constant 2 : i32
    %69 = arith.cmpi slt, %arg0, %c2_i32_39 : i32
    %70 = arith.extui %69 : i1 to i32
    %c0_i32_40 = arith.constant 0 : i32
    %71 = arith.cmpi ne, %70, %c0_i32_40 : i32
    scf.if %71 {
      %c0_i32_45 = arith.constant 0 : i32
      %c128_i32_46 = arith.constant 128 : i32
      %78 = arith.addi %c0_i32_45, %c128_i32_46 : i32
      %c1_i32_47 = arith.constant 1 : i32
      scf.for %arg16 = %c0_i32_45 to %78 step %c1_i32_47  : i32 {
        %c1_i32_49 = arith.constant 1 : i32
        %79 = arith.muli %arg16, %c1_i32_49 : i32
        %c0_i32_50 = arith.constant 0 : i32
        %80 = arith.addi %c0_i32_50, %79 : i32
        %81 = arith.addi %11, %80 : i32
        %82 = arith.index_cast %81 : i32 to index
        %83 = memref.load %arg1[%82] : memref<384xi32, #tpu.memory_space<smem>>
        %84 = arith.addi %13, %80 : i32
        %c0_i32_51 = arith.constant 0 : i32
        %85 = tpu.memref_slice %arg13[%84, %c0_i32_51] : memref<256x128xf32, #tpu.memory_space<vmem>> -> memref<1x128xf32, #tpu.memory_space<vmem>>
        %c0_i32_52 = arith.constant 0 : i32
        %86 = tpu.memref_slice %arg11[%83, %c0_i32_52] : memref<512x128xf32, #tpu.memory_space<any>> -> memref<1x128xf32, #tpu.memory_space<any>>
        %87 = tpu.memref_slice %arg15[%9] : memref<2x!tpu.dma_semaphore, #tpu.memory_space<semaphore_mem>> -> memref<1x!tpu.dma_semaphore, #tpu.memory_space<semaphore_mem>>
        %88 = tpu.memref_squeeze %87 : memref<1x!tpu.dma_semaphore, #tpu.memory_space<semaphore_mem>> -> memref<!tpu.dma_semaphore, #tpu.memory_space<semaphore_mem>>
        tpu.enqueue_dma source(%85 : memref<1x128xf32, #tpu.memory_space<vmem>>) target(%86 : memref<1x128xf32, #tpu.memory_space<any>>) target_semaphore(%88 : memref<!tpu.dma_semaphore, #tpu.memory_space<semaphore_mem>>)
      }
      %c128_i32_48 = arith.constant 128 : i32
    } else {
    }
    %c2_i32_41 = arith.constant 2 : i32
    %72 = arith.cmpi eq, %arg0, %c2_i32_41 : i32
    %73 = arith.extui %72 : i1 to i32
    %c0_i32_42 = arith.constant 0 : i32
    %74 = arith.cmpi ne, %73, %c0_i32_42 : i32
    scf.if %74 {
      %c0_i32_45 = arith.constant 0 : i32
      %c44_i32 = arith.constant 44 : i32
      %78 = arith.addi %c0_i32_45, %c44_i32 : i32
      %c1_i32_46 = arith.constant 1 : i32
      scf.for %arg16 = %c0_i32_45 to %78 step %c1_i32_46  : i32 {
        %c1_i32_48 = arith.constant 1 : i32
        %79 = arith.muli %arg16, %c1_i32_48 : i32
        %c0_i32_49 = arith.constant 0 : i32
        %80 = arith.addi %c0_i32_49, %79 : i32
        %81 = arith.addi %11, %80 : i32
        %82 = arith.index_cast %81 : i32 to index
        %83 = memref.load %arg1[%82] : memref<384xi32, #tpu.memory_space<smem>>
        %84 = arith.addi %13, %80 : i32
        %c0_i32_50 = arith.constant 0 : i32
        %85 = tpu.memref_slice %arg13[%84, %c0_i32_50] : memref<256x128xf32, #tpu.memory_space<vmem>> -> memref<1x128xf32, #tpu.memory_space<vmem>>
        %c0_i32_51 = arith.constant 0 : i32
        %86 = tpu.memref_slice %arg11[%83, %c0_i32_51] : memref<512x128xf32, #tpu.memory_space<any>> -> memref<1x128xf32, #tpu.memory_space<any>>
        %87 = tpu.memref_slice %arg15[%9] : memref<2x!tpu.dma_semaphore, #tpu.memory_space<semaphore_mem>> -> memref<1x!tpu.dma_semaphore, #tpu.memory_space<semaphore_mem>>
        %88 = tpu.memref_squeeze %87 : memref<1x!tpu.dma_semaphore, #tpu.memory_space<semaphore_mem>> -> memref<!tpu.dma_semaphore, #tpu.memory_space<semaphore_mem>>
        tpu.enqueue_dma source(%85 : memref<1x128xf32, #tpu.memory_space<vmem>>) target(%86 : memref<1x128xf32, #tpu.memory_space<any>>) target_semaphore(%88 : memref<!tpu.dma_semaphore, #tpu.memory_space<semaphore_mem>>)
      }
      %c44_i32_47 = arith.constant 44 : i32
    } else {
    }
    %c2_i32_43 = arith.constant 2 : i32
    %75 = arith.cmpi eq, %arg0, %c2_i32_43 : i32
    %76 = arith.extui %75 : i1 to i32
    %c0_i32_44 = arith.constant 0 : i32
    %77 = arith.cmpi ne, %76, %c0_i32_44 : i32
    scf.if %77 {
      %c0_i32_45 = arith.constant 0 : i32
      %c128_i32_46 = arith.constant 128 : i32
      %78 = arith.addi %c0_i32_45, %c128_i32_46 : i32
      %c1_i32_47 = arith.constant 1 : i32
      scf.for %arg16 = %c0_i32_45 to %78 step %c1_i32_47  : i32 {
        %c1_i32_52 = arith.constant 1 : i32
        %80 = arith.muli %arg16, %c1_i32_52 : i32
        %c0_i32_53 = arith.constant 0 : i32
        %81 = arith.addi %c0_i32_53, %80 : i32
        %82 = arith.addi %15, %81 : i32
        %c0_i32_54 = arith.constant 0 : i32
        %83 = tpu.memref_slice %arg13[%82, %c0_i32_54] : memref<256x128xf32, #tpu.memory_space<vmem>> -> memref<1x128xf32, #tpu.memory_space<vmem>>
        %c0_i32_55 = arith.constant 0 : i32
        %c0_i32_56 = arith.constant 0 : i32
        %84 = tpu.memref_slice %arg11[%c0_i32_55, %c0_i32_56] : memref<512x128xf32, #tpu.memory_space<any>> -> memref<1x128xf32, #tpu.memory_space<any>>
        %85 = tpu.memref_slice %arg15[%10] : memref<2x!tpu.dma_semaphore, #tpu.memory_space<semaphore_mem>> -> memref<1x!tpu.dma_semaphore, #tpu.memory_space<semaphore_mem>>
        %86 = tpu.memref_squeeze %85 : memref<1x!tpu.dma_semaphore, #tpu.memory_space<semaphore_mem>> -> memref<!tpu.dma_semaphore, #tpu.memory_space<semaphore_mem>>
        tpu.wait_dma2 semaphore(%86 : memref<!tpu.dma_semaphore, #tpu.memory_space<semaphore_mem>>) src(%83 : memref<1x128xf32, #tpu.memory_space<vmem>>) dst(%84 : memref<1x128xf32, #tpu.memory_space<any>>)
      }
      %c128_i32_48 = arith.constant 128 : i32
      %c0_i32_49 = arith.constant 0 : i32
      %c44_i32 = arith.constant 44 : i32
      %79 = arith.addi %c0_i32_49, %c44_i32 : i32
      %c1_i32_50 = arith.constant 1 : i32
      scf.for %arg16 = %c0_i32_49 to %79 step %c1_i32_50  : i32 {
        %c1_i32_52 = arith.constant 1 : i32
        %80 = arith.muli %arg16, %c1_i32_52 : i32
        %c0_i32_53 = arith.constant 0 : i32
        %81 = arith.addi %c0_i32_53, %80 : i32
        %82 = arith.addi %13, %81 : i32
        %c0_i32_54 = arith.constant 0 : i32
        %83 = tpu.memref_slice %arg13[%82, %c0_i32_54] : memref<256x128xf32, #tpu.memory_space<vmem>> -> memref<1x128xf32, #tpu.memory_space<vmem>>
        %c0_i32_55 = arith.constant 0 : i32
        %c0_i32_56 = arith.constant 0 : i32
        %84 = tpu.memref_slice %arg11[%c0_i32_55, %c0_i32_56] : memref<512x128xf32, #tpu.memory_space<any>> -> memref<1x128xf32, #tpu.memory_space<any>>
        %85 = tpu.memref_slice %arg15[%9] : memref<2x!tpu.dma_semaphore, #tpu.memory_space<semaphore_mem>> -> memref<1x!tpu.dma_semaphore, #tpu.memory_space<semaphore_mem>>
        %86 = tpu.memref_squeeze %85 : memref<1x!tpu.dma_semaphore, #tpu.memory_space<semaphore_mem>> -> memref<!tpu.dma_semaphore, #tpu.memory_space<semaphore_mem>>
        tpu.wait_dma2 semaphore(%86 : memref<!tpu.dma_semaphore, #tpu.memory_space<semaphore_mem>>) src(%83 : memref<1x128xf32, #tpu.memory_space<vmem>>) dst(%84 : memref<1x128xf32, #tpu.memory_space<any>>)
      }
      %c44_i32_51 = arith.constant 44 : i32
    } else {
    }
    return
  }
  func.func @transform_1(%arg0: i32, %arg1: memref<384xi32, #tpu.memory_space<smem>>) -> (i32, i32) {
    %c0_i32 = arith.constant 0 : i32
    %c0_i32_0 = arith.constant 0 : i32
    return %arg0, %c0_i32 : i32, i32
  }
  func.func @transform_2(%arg0: i32, %arg1: memref<384xi32, #tpu.memory_space<smem>>) -> (i32, i32) {
    %c0_i32 = arith.constant 0 : i32
    %c0_i32_0 = arith.constant 0 : i32
    %c0_i32_1 = arith.constant 0 : i32
    return %c0_i32, %c0_i32_0 : i32, i32
  }
  func.func @transform_3(%arg0: i32, %arg1: memref<384xi32, #tpu.memory_space<smem>>) -> (i32, i32) {
    %c0_i32 = arith.constant 0 : i32
    %c0_i32_0 = arith.constant 0 : i32
    %c0_i32_1 = arith.constant 0 : i32
    return %c0_i32, %c0_i32_0 : i32, i32
  }
  func.func @transform_4(%arg0: i32, %arg1: memref<384xi32, #tpu.memory_space<smem>>) -> (i32, i32) {
    %c0_i32 = arith.constant 0 : i32
    %c0_i32_0 = arith.constant 0 : i32
    %c0_i32_1 = arith.constant 0 : i32
    return %c0_i32, %c0_i32_0 : i32, i32
  }
  func.func @transform_5(%arg0: i32, %arg1: memref<384xi32, #tpu.memory_space<smem>>) -> (i32, i32) {
    %c0_i32 = arith.constant 0 : i32
    %c0_i32_0 = arith.constant 0 : i32
    %c0_i32_1 = arith.constant 0 : i32
    return %c0_i32, %c0_i32_0 : i32, i32
  }
  func.func @transform_6(%arg0: i32, %arg1: memref<384xi32, #tpu.memory_space<smem>>) -> (i32, i32) {
    %c0_i32 = arith.constant 0 : i32
    %c0_i32_0 = arith.constant 0 : i32
    %c0_i32_1 = arith.constant 0 : i32
    return %c0_i32, %c0_i32_0 : i32, i32
  }
  func.func @transform_7(%arg0: i32, %arg1: memref<384xi32, #tpu.memory_space<smem>>) -> (i32, i32) {
    %c0_i32 = arith.constant 0 : i32
    %c0_i32_0 = arith.constant 0 : i32
    %c0_i32_1 = arith.constant 0 : i32
    return %c0_i32, %c0_i32_0 : i32, i32
  }
  func.func @transform_8(%arg0: i32, %arg1: memref<384xi32, #tpu.memory_space<smem>>) -> (i32, i32) {
    %c0_i32 = arith.constant 0 : i32
    %c0_i32_0 = arith.constant 0 : i32
    %c0_i32_1 = arith.constant 0 : i32
    return %c0_i32, %c0_i32_0 : i32, i32
  }
}

</mosaic_0001>

<bundles_post_ra>
// kernel: tgn_update.1
= control target key start
LH: loop header
LB: loop body
LE: loop exit
PB: predicated region body
PF: predicated region fallthrough
CT: control target
= control target key end

     0   :  { %s3184_s0 = inlined_call_operand.vmem [shape: s32[384], index: 0, kind: input, shape index: {}]   ;;  %s3185_s1 = inlined_call_operand.vmem [shape: f32[512,128], index: 1, kind: input, shape index: {}, may-alias: {1,10}]   ;;  %s3186_s2 = inlined_call_operand.vmem [shape: f32[384,128], index: 2, kind: input, shape index: {}]   ;;  %s3187_s3 = inlined_call_operand.vmem [shape: f32[128,256], index: 3, kind: input, shape index: {}]   ;;  %s3188_s4 = inlined_call_operand.vmem [shape: f32[128,256], index: 4, kind: input, shape index: {}]   ;;  %s3189_s5 = inlined_call_operand.vmem [shape: f32[128,128], index: 5, kind: input, shape index: {}]   ;;  %s3190_s6 = inlined_call_operand.vmem [shape: f32[128,128], index: 6, kind: input, shape index: {}]   ;;  %s3191_s7 = inlined_call_operand.vmem [shape: f32[1,256], index: 7, kind: input, shape index: {}]   ;;  %s3192_s8 = inlined_call_operand.vmem [shape: f32[1,128], index: 8, kind: input, shape index: {}]   ;;  %s3193_s9 = inlined_call_operand.vmem [shape: f32[1,128], index: 9, kind: input, shape index: {}]   ;;  %s3194_s10 = inlined_call_operand.vmem [shape: f32[512,128], index: 10, kind: output, shape index: {}, may-alias: {1,10}]  }
   0x1   :  { %s15_s15 = sshll.u32 %s3184_s0, 4  ;;  %s16_s15 = int_to_ptr.vmem [resolvable:$true] %s15_s15 }
   0x2   :  { %s2282_s16 = scalar_lea.vmem %s16_s15, 48  ;;  %s2286_s17 = scalar_lea.vmem %s16_s15, 64 }
   0x3   :  { %p2283_p0 = scmp.ne.s32.totalorder %s16_s15, %s2282_s16  ;;  %p2287_p1 = scmp.lt.s32.totalorder %s16_s15, %s16_s15 }
   0x4   :  { %p2288_p2 = scmp.lt.s32.totalorder %s2286_s17, %s2282_s16 }
   0x6   :  { %p2289_p3 = por %p2288_p2, %p2287_p1 }
   0x8   :  { %p2290_p4 = pnand %p2289_p3, %p2283_p0 }
   0xa   :  { %2293 = shalt.err (!%p2290_p4)  }
   0xb   :  { %s2376_s18 = smov [#allocation7]  }
   0xc   :  { %18 = dma.vmem_to_smem %s16_s15, 48, %s2376_s18, [#allocation6] }
   0xd   :  { %2330 = dma.done.wait [#allocation6], 48 }
   0xe   :  { %2331 = vsyncadd [#allocation6], 4294967248 }
   0xf   :  { %20 = sfence }
  0x10   :  { %s2436_s19 = smov 0  }
  0x11 LB: > { %s2442_s0 = sadd.s32 4294967295, %s2342_s19   ;;  %p1801_p5 = scmp.lt.s32.totalorder %s2342_s19, 1  ;;  %s2342_s19 = sphi %s2436_s19, %s26_s19  }
  0x12   : > { %s1802_s20 = sshll.u32 (!%p1801_p5), %s2442_s0, 4  ;;  %p217_p6 = scmp.lt.s32.totalorder (!%p1801_p5), %s2442_s0, 0 }
  0x13   : > { %188 = sbr.rel (%p1801_p5) target bundleno = 509 (0x1fd), region = 52  ;;  %p212_p7 = scmp.lt.s32.totalorder (!%p1801_p5), %s1802_s20, 47 }
  0x14   : > { %s218_s21 = ssub.s32 (!%p1801_p5), 0, %s2442_s0  ;;  %s2450_s23 = sshll.u32 (!%p1801_p5), %s2442_s0, 7 }
  0x15   : > { %s1804_s22 = smin.u32 (!%p1801_p5), %s2442_s0, %s218_s21  ;;  %p1810_p9 = scmp.ne.s32.totalorder (!%p1801_p5), %s2442_s0, 0 }
  0x16   : > { %s220_s24 = sand.u32 (!%p1801_p5), 1, %s1804_s22  }
  0x17   : > { %s221_s26 = ssub.s32 (!%p1801_p5), 0, %s220_s24 }
  0x18   : > { %s3196_s20 = smov (!%p212_p7, %s1802_s20), 47  ;;  %s3198_s26 = smov (!%p217_p6, %s221_s26), %s220_s24 }
  0x19   : > { %s1803_s25 = sshll.u32 %s3196_s20, 3  ;;  %p1806_p8 = scmp.lt.s32.totalorder %s3198_s26, 0 }
  0x1a   : > { %s2455_s29 = scalar_lea.vmem %s3186_s2, %s1803_s25  ;;  %s227_s30 = sadd.s32 2, %s3198_s26 }
  0x1b   : > { %s3200_s30 = smov (!%p1806_p8, %s227_s30), %s3198_s26  ;;  %236 = sbr.rel (%p1810_p9) target bundleno = 49 (0x31), region = 56 }
  0x1c   : > { %s2460_s11 = ssub.s32 1, %s3200_s30  ;;  %s2463_s12 = sshll.u32 %s3200_s30, 7 }
  0x1d   : > { %s1809_s13 = sshll.u32 %s2460_s11, 7  ;;  %s2344_s14 = smov (!%p1810_p9), 0  }
  0x20 LB: >> { %s243_s15 = sld [smem:[#allocation7 + %s2346_s14]]  ;;  %s244_s16 = sadd.s32 %s2346_s14, %s2463_s12  ;;  %s2346_s14 = sphi %s2344_s14, %s242_s14  }
  0x21   : >> { %s246_s21 = scalar_lea.vmem [#allocation2], %s244_s16  ;;  %s247_s22 = scalar_lea.sflag [#allocation4], %s3200_s30 }
  0x26   : >> { %s245_s20 = scalar_lea.vmem %s3185_s1, %s243_s15 }
  0x27   : >> { %v266_v0 = vld [vmem:[%s245_s20] sm:$0x1] }
  0x28   : >> { %267 = vst [vmem:[%s246_s21] sm:$0x1] %v266_v0 }
  0x29   : >> { %293 = vsyncadd %s247_s22, 16  ;;  %s242_s14 = sadd.s32 1, %s2346_s14  }
  0x2a   : >> { %p239_p10 = scmp.ge.s32.totalorder %s242_s14, 128  }
  0x2c   : > { %241 = sbr.rel (!%p239_p10) target bundleno = 32 (0x20), region = 322 }
  0x31 PF: > { %p1811_p11 = scmp.ge.s32.totalorder %s2442_s0, 2 }
  0x32   : > { %s1855_s24 = sadd.s32 (!%p1811_p11), 128, %s2450_s23  ;;  %s2348_s25 = smov (!%p1811_p11), 0  }
  0x33   : > { %297 = sbr.rel (%p1811_p11) target bundleno = 74 (0x4a), region = 97 }
  0x38 LB: >> { %s306_s26 = sadd.s32 %s2350_s25, %s1855_s24  ;;  %s308_s28 = sadd.s32 %s2350_s25, %s1809_s13  ;;  %s2350_s25 = sphi %s2348_s25, %s305_s25  }
  0x39   : >> { %s307_s27 = sld [smem:[#allocation7 + %s306_s26]]  ;;  %s310_s17 = scalar_lea.vmem [#allocation2], %s308_s28 }
  0x3a   : >> { %s311_s18 = scalar_lea.sflag [#allocation4], %s2460_s11 }
  0x3f   : >> { %s309_s16 = scalar_lea.vmem %s3185_s1, %s307_s27 }
  0x40   : >> { %v330_v1 = vld [vmem:[%s309_s16] sm:$0x1] }
  0x41   : >> { %331 = vst [vmem:[%s310_s17] sm:$0x1] %v330_v1 }
  0x42   : >> { %357 = vsyncadd %s311_s18, 16  ;;  %s305_s25 = sadd.s32 1, %s2350_s25  }
  0x43   : >> { %p302_p12 = scmp.ge.s32.totalorder %s305_s25, 128  }
  0x45   : > { %304 = sbr.rel (!%p302_p12) target bundleno = 56 (0x38), region = 333 }
  0x4a PF: > { %s2352_s20 = smov 0  }
  0x4b LB: >> { %s364_s21 = scalar_lea.sflag [#allocation4], %s3200_s30  ;;  %s2354_s20 = sphi %s2352_s20, %s363_s20  }
  0x4c   : >> { %2332 = dma.done.wait %s364_s21, 16 }
  0x4d   : >> { %2333 = vsyncadd %s364_s21, 4294967280  ;;  %s363_s20 = sadd.s32 1, %s2354_s20  }
  0x4e   : >> { %p360_p13 = scmp.ge.s32.totalorder %s363_s20, 128  }
  0x4f   : > { %p1813_p0 = scmp.lt.s32.totalorder (%p360_p13), %s2442_s0, 2 }
  0x50   : > { %362 = sbr.rel (!%p360_p13) target bundleno = 75 (0x4b), region = 344 }
  0x55   : > { %371 = sbr.rel (%p1813_p0) target bundleno = 100 (0x64), region = 145  ;;  %s2356_s22 = smov (!%p1813_p0), 0  }
  0x5a LB: >> { %s378_s13 = scalar_lea.sflag [#allocation5], %s3200_s30  ;;  %s2358_s22 = sphi %s2356_s22, %s377_s22  }
  0x5b   : >> { %2334 = dma.done.wait %s378_s13, 16 }
  0x5c   : >> { %2335 = vsyncadd %s378_s13, 4294967280  ;;  %s377_s22 = sadd.s32 1, %s2358_s22  }
  0x5d   : >> { %p374_p1 = scmp.ge.s32.totalorder %s377_s22, 128  }
  0x5f   : > { %376 = sbr.rel (!%p374_p1) target bundleno = 90 (0x5a), region = 355 }
  0x64 PF: > { %v478_v2 = vld [vmem:[%s3188_s4 + $0xf8] sm:$0xff]  ;;  %v477_v4 = vld [vmem:[%s3188_s4 + $0xf0] sm:$0xff]  ;;  %v476_v6 = vld [vmem:[%s3188_s4 + $0xe8] sm:$0xff]  ;;  %s2678_s26 = scalar_lea.vmem [#allocation2], %s2463_s12  ;;  %s3105_s16 = scalar_lea.vmem [#allocation3], %s2463_s12 }
  0x65   : > { %v446_v3 = vld [vmem:[%s3187_s3 + $0xf8] sm:$0xff]  ;;  %479 = vmatprep.subr.mxu0 %v478_v2  ;;  %v445_v5 = vld [vmem:[%s3187_s3 + $0xf0] sm:$0xff]  ;;  %v444_v7 = vld [vmem:[%s3187_s3 + $0xe8] sm:$0xff]  ;;  %s2360_s17 = smov (!%p1811_p11), 0  }
  0x66   : > { %640 = vmatprep.subr.mxu1 %v446_v3  ;;  %480 = vmatpush1.msra.mxu0 %v477_v4  ;;  %v475_v8 = vld [vmem:[%s3188_s4 + $0xe0] sm:$0xff]  ;;  %v474_v10 = vld [vmem:[%s3188_s4 + $0xd8] sm:$0xff]  ;;  %v473_v12 = vld [vmem:[%s3188_s4 + $0xd0] sm:$0xff]  ;;  %v2377_v4 = vmov 0.0  }
  0x67   : > { %641 = vmatpush1.msra.mxu1 %v445_v5  ;;  %v443_v9 = vld [vmem:[%s3187_s3 + $0xe0] sm:$0xff]  ;;  %481 = vmatprep.subr.mxu0 %v476_v6  ;;  %v442_v11 = vld [vmem:[%s3187_s3 + $0xd8] sm:$0xff]  ;;  %v441_v13 = vld [vmem:[%s3187_s3 + $0xd0] sm:$0xff] }
  0x68   : > { %642 = vmatprep.subr.mxu1 %v444_v7  ;;  %482 = vmatpush1.msra.mxu0 %v475_v8  ;;  %v472_v14 = vld [vmem:[%s3188_s4 + $0xc8] sm:$0xff]  ;;  %v471_v16 = vld [vmem:[%s3188_s4 + $0xc0] sm:$0xff]  ;;  %v470_v18 = vld [vmem:[%s3188_s4 + $0xb8] sm:$0xff] }
  0x69   : > { %643 = vmatpush1.msra.mxu1 %v443_v9  ;;  %v440_v15 = vld [vmem:[%s3187_s3 + $0xc8] sm:$0xff]  ;;  %483 = vmatprep.subr.mxu0 %v474_v10  ;;  %v439_v17 = vld [vmem:[%s3187_s3 + $0xc0] sm:$0xff]  ;;  %v438_v19 = vld [vmem:[%s3187_s3 + $0xb8] sm:$0xff] }
  0x6a   : > { %644 = vmatprep.subr.mxu1 %v442_v11  ;;  %484 = vmatpush1.msra.mxu0 %v473_v12  ;;  %v469_v20 = vld [vmem:[%s3188_s4 + $0xb0] sm:$0xff]  ;;  %v468_v22 = vld [vmem:[%s3188_s4 + $0xa8] sm:$0xff]  ;;  %v467_v24 = vld [vmem:[%s3188_s4 + $0xa0] sm:$0xff] }
  0x6b   : > { %645 = vmatpush1.msra.mxu1 %v441_v13  ;;  %485 = vmatprep.subr.mxu0 %v472_v14  ;;  %v437_v21 = vld [vmem:[%s3187_s3 + $0xb0] sm:$0xff]  ;;  %v436_v23 = vld [vmem:[%s3187_s3 + $0xa8] sm:$0xff]  ;;  %v435_v25 = vld [vmem:[%s3187_s3 + $0xa0] sm:$0xff] }
  0x6c   : > { %646 = vmatprep.subr.mxu1 %v440_v15  ;;  %486 = vmatpush1.msra.mxu0 %v471_v16  ;;  %v466_v26 = vld [vmem:[%s3188_s4 + $0x98] sm:$0xff]  ;;  %v465_v28 = vld [vmem:[%s3188_s4 + $0x90] sm:$0xff]  ;;  %v464_v30 = vld [vmem:[%s3188_s4 + $0x88] sm:$0xff] }
  0x6d   : > { %647 = vmatpush1.msra.mxu1 %v439_v17  ;;  %487 = vmatprep.subr.mxu0 %v470_v18  ;;  %v434_v27 = vld [vmem:[%s3187_s3 + $0x98] sm:$0xff]  ;;  %v433_v29 = vld [vmem:[%s3187_s3 + $0x90] sm:$0xff]  ;;  %v432_v31 = vld [vmem:[%s3187_s3 + $0x88] sm:$0xff] }
  0x6e   : > { %648 = vmatprep.subr.mxu1 %v438_v19  ;;  %488 = vmatpush1.msra.mxu0 %v469_v20  ;;  %v463_v32 = vld [vmem:[%s3188_s4 + $0x80] sm:$0xff]  ;;  %v462_v34 = vld [vmem:[%s3188_s4 + $0x78] sm:$0xff]  ;;  %v461_v36 = vld [vmem:[%s3188_s4 + $0x70] sm:$0xff] }
  0x6f   : > { %649 = vmatpush1.msra.mxu1 %v437_v21  ;;  %489 = vmatprep.subr.mxu0 %v468_v22  ;;  %v431_v33 = vld [vmem:[%s3187_s3 + $0x80] sm:$0xff]  ;;  %v430_v35 = vld [vmem:[%s3187_s3 + $0x78] sm:$0xff]  ;;  %v429_v37 = vld [vmem:[%s3187_s3 + $0x70] sm:$0xff] }
  0x70   : > { %650 = vmatprep.subr.mxu1 %v436_v23  ;;  %490 = vmatpush1.msra.mxu0 %v467_v24  ;;  %v460_v38 = vld [vmem:[%s3188_s4 + $0x68] sm:$0xff]  ;;  %v459_v40 = vld [vmem:[%s3188_s4 + $0x60] sm:$0xff]  ;;  %v458_v42 = vld [vmem:[%s3188_s4 + $0x58] sm:$0xff] }
  0x71   : > { %651 = vmatpush1.msra.mxu1 %v435_v25  ;;  %491 = vmatprep.subr.mxu0 %v466_v26  ;;  %v428_v39 = vld [vmem:[%s3187_s3 + $0x68] sm:$0xff]  ;;  %v427_v41 = vld [vmem:[%s3187_s3 + $0x60] sm:$0xff]  ;;  %v426_v43 = vld [vmem:[%s3187_s3 + $0x58] sm:$0xff] }
  0x72   : > { %652 = vmatprep.subr.mxu1 %v434_v27  ;;  %492 = vmatpush1.msra.mxu0 %v465_v28  ;;  %v457_v44 = vld [vmem:[%s3188_s4 + $0x50] sm:$0xff]  ;;  %v456_v46 = vld [vmem:[%s3188_s4 + $0x48] sm:$0xff]  ;;  %v455_v48 = vld [vmem:[%s3188_s4 + $0x40] sm:$0xff] }
  0x73   : > { %653 = vmatpush1.msra.mxu1 %v433_v29  ;;  %493 = vmatprep.subr.mxu0 %v464_v30  ;;  %v425_v45 = vld [vmem:[%s3187_s3 + $0x50] sm:$0xff]  ;;  %v424_v47 = vld [vmem:[%s3187_s3 + $0x48] sm:$0xff]  ;;  %v423_v49 = vld [vmem:[%s3187_s3 + $0x40] sm:$0xff] }
  0x74   : > { %654 = vmatprep.subr.mxu1 %v432_v31  ;;  %494 = vmatpush1.msra.mxu0 %v463_v32  ;;  %v454_v50 = vld [vmem:[%s3188_s4 + $0x38] sm:$0xff]  ;;  %v453_v52 = vld [vmem:[%s3188_s4 + $0x30] sm:$0xff]  ;;  %v452_v54 = vld [vmem:[%s3188_s4 + $0x28] sm:$0xff] }
  0x75   : > { %655 = vmatpush1.msra.mxu1 %v431_v33  ;;  %495 = vmatprep.subr.mxu0 %v462_v34  ;;  %v422_v51 = vld [vmem:[%s3187_s3 + $0x38] sm:$0xff]  ;;  %v421_v53 = vld [vmem:[%s3187_s3 + $0x30] sm:$0xff]  ;;  %v420_v55 = vld [vmem:[%s3187_s3 + $0x28] sm:$0xff] }
  0x76   : > { %656 = vmatprep.subr.mxu1 %v430_v35  ;;  %496 = vmatpush1.msra.mxu0 %v461_v36  ;;  %v451_v56 = vld [vmem:[%s3188_s4 + $0x20] sm:$0xff]  ;;  %v450_v58 = vld [vmem:[%s3188_s4 + $0x18] sm:$0xff]  ;;  %v449_v60 = vld [vmem:[%s3188_s4 + $0x10] sm:$0xff] }
  0x77   : > { %657 = vmatpush1.msra.mxu1 %v429_v37  ;;  %497 = vmatprep.subr.mxu0 %v460_v38  ;;  %v419_v57 = vld [vmem:[%s3187_s3 + $0x20] sm:$0xff]  ;;  %v418_v59 = vld [vmem:[%s3187_s3 + $0x18] sm:$0xff]  ;;  %v417_v61 = vld [vmem:[%s3187_s3 + $0x10] sm:$0xff] }
  0x78   : > { %658 = vmatprep.subr.mxu1 %v428_v39  ;;  %498 = vmatpush1.msra.mxu0 %v459_v40  ;;  %v448_v62 = vld [vmem:[%s3188_s4 + $0x8] sm:$0xff]  ;;  %v447_v0 = vld [vmem:[%s3188_s4] sm:$0xff]  ;;  %v1220_v5 = vld [vmem:[%s3190_s6 + $0x78] sm:$0xff] }
  0x79   : > { %659 = vmatpush1.msra.mxu1 %v427_v41  ;;  %499 = vmatprep.subr.mxu0 %v458_v42  ;;  %v416_v63 = vld [vmem:[%s3187_s3 + $0x8] sm:$0xff]  ;;  %v415_v1 = vld [vmem:[%s3187_s3] sm:$0xff]  ;;  %v1052_v6 = vld [vmem:[%s3189_s5 + $0x78] sm:$0xff] }
  0x7a   : > { %660 = vmatprep.subr.mxu1 %v426_v43  ;;  %500 = vmatpush1.msra.mxu0 %v457_v44  ;;  %v2681_v2 = vld [vmem:[%s2678_s26] sm:$0xff]  ;;  %v2697_v7 = vld [vmem:[%s2678_s26 + $0x8] sm:$0xff]  ;;  %v1219_v9 = vld [vmem:[%s3190_s6 + $0x70] sm:$0xff] }
  0x7b   : > { %661 = vmatpush1.msra.mxu1 %v425_v45  ;;  %501 = vmatprep.subr.mxu0 %v456_v46  ;;  %v2684_v3 = vld [vmem:[%s2455_s29] sm:$0xff]  ;;  %v2700_v8 = vld [vmem:[%s2455_s29 + $0x8] sm:$0xff]  ;;  %v1051_v10 = vld [vmem:[%s3189_s5 + $0x70] sm:$0xff] }
  0x7c   : > { %662 = vmatprep.subr.mxu1 %v424_v47  ;;  %502 = vmatpush1.msra.mxu0 %v455_v48  ;;  %v2713_v11 = vld [vmem:[%s2678_s26 + $0x10] sm:$0xff]  ;;  %v1218_v13 = vld [vmem:[%s3190_s6 + $0x68] sm:$0xff]  ;;  %v2729_v15 = vld [vmem:[%s2678_s26 + $0x18] sm:$0xff] }
  0x7d   : > { %663 = vmatpush1.msra.mxu1 %v423_v49  ;;  %503 = vmatprep.subr.mxu0 %v454_v50  ;;  %v2716_v12 = vld [vmem:[%s2455_s29 + $0x10] sm:$0xff]  ;;  %v1050_v14 = vld [vmem:[%s3189_s5 + $0x68] sm:$0xff]  ;;  %v2732_v16 = vld [vmem:[%s2455_s29 + $0x18] sm:$0xff] }
  0x7e   : > { %664 = vmatprep.subr.mxu1 %v422_v51  ;;  %504 = vmatpush1.msra.mxu0 %v453_v52  ;;  %v1217_v17 = vld [vmem:[%s3190_s6 + $0x60] sm:$0xff]  ;;  %v1216_v21 = vld [vmem:[%s3190_s6 + $0x58] sm:$0xff]  ;;  %v2761_v23 = vld [vmem:[%s2678_s26 + $0x28] sm:$0xff] }
  0x7f   : > { %665 = vmatpush1.msra.mxu1 %v421_v53  ;;  %505 = vmatprep.subr.mxu0 %v452_v54  ;;  %v1049_v18 = vld [vmem:[%s3189_s5 + $0x60] sm:$0xff]  ;;  %v1048_v22 = vld [vmem:[%s3189_s5 + $0x58] sm:$0xff]  ;;  %v2764_v24 = vld [vmem:[%s2455_s29 + $0x28] sm:$0xff] }
  0x80   : > { %666 = vmatprep.subr.mxu1 %v420_v55  ;;  %506 = vmatpush1.msra.mxu0 %v451_v56  ;;  %v2745_v19 = vld [vmem:[%s2678_s26 + $0x20] sm:$0xff]  ;;  %v1215_v25 = vld [vmem:[%s3190_s6 + $0x50] sm:$0xff]  ;;  %v1214_v29 = vld [vmem:[%s3190_s6 + $0x48] sm:$0xff] }
  0x81   : > { %667 = vmatpush1.msra.mxu1 %v419_v57  ;;  %507 = vmatprep.subr.mxu0 %v450_v58  ;;  %v2748_v20 = vld [vmem:[%s2455_s29 + $0x20] sm:$0xff]  ;;  %v1047_v26 = vld [vmem:[%s3189_s5 + $0x50] sm:$0xff]  ;;  %v1046_v30 = vld [vmem:[%s3189_s5 + $0x48] sm:$0xff] }
  0x82   : > { %668 = vmatprep.subr.mxu1 %v418_v59  ;;  %508 = vmatpush1.msra.mxu0 %v449_v60  ;;  %v2777_v27 = vld [vmem:[%s2678_s26 + $0x30] sm:$0xff]  ;;  %v2793_v31 = vld [vmem:[%s2678_s26 + $0x38] sm:$0xff]  ;;  %v1213_v33 = vld [vmem:[%s3190_s6 + $0x40] sm:$0xff] }
  0x83   : > { %669 = vmatpush1.msra.mxu1 %v417_v61  ;;  %509 = vmatprep.subr.mxu0 %v448_v62  ;;  %v2780_v28 = vld [vmem:[%s2455_s29 + $0x30] sm:$0xff]  ;;  %v2796_v32 = vld [vmem:[%s2455_s29 + $0x38] sm:$0xff]  ;;  %v1045_v34 = vld [vmem:[%s3189_s5 + $0x40] sm:$0xff] }
  0x84   : > { %670 = vmatprep.subr.mxu1 %v416_v63  ;;  %510 = vmatpush1.msra.mxu0 %v447_v0  ;;  %v2809_v35 = vld [vmem:[%s2678_s26 + $0x40] sm:$0xff]  ;;  %v1212_v37 = vld [vmem:[%s3190_s6 + $0x38] sm:$0xff]  ;;  %v2825_v39 = vld [vmem:[%s2678_s26 + $0x48] sm:$0xff] }
  0x85   : > { %543 = vmatprep.mubr.f32.mxu0 %v2377_v4  ;;  %671 = vmatpush1.msra.mxu1 %v415_v1  ;;  %v2812_v36 = vld [vmem:[%s2455_s29 + $0x40] sm:$0xff]  ;;  %v1044_v38 = vld [vmem:[%s3189_s5 + $0x38] sm:$0xff]  ;;  %v2828_v40 = vld [vmem:[%s2455_s29 + $0x48] sm:$0xff] }
  0x86   : > { %704 = vmatprep.mubr.f32.mxu1 %v2377_v4  ;;  %544 = vmatmul.mubr.f32.vlgmr.msra.gmra.mxu0 %v2681_v2  ;;  %v1211_v41 = vld [vmem:[%s3190_s6 + $0x30] sm:$0xff]  ;;  %v1210_v45 = vld [vmem:[%s3190_s6 + $0x28] sm:$0xff]  ;;  %v2857_v47 = vld [vmem:[%s2678_s26 + $0x58] sm:$0xff] }
  0x87   : > { %705 = vmatmul.mubr.f32.vlgmr.msra.gmra.mxu1 %v2684_v3  ;;  %1976 = vmatprep.subr.mxu1 %v1220_v5  ;;  %v1043_v42 = vld [vmem:[%s3189_s5 + $0x30] sm:$0xff]  ;;  %v1042_v46 = vld [vmem:[%s3189_s5 + $0x28] sm:$0xff]  ;;  %v2860_v48 = vld [vmem:[%s2455_s29 + $0x58] sm:$0xff] }
  0x88   : > { %1920 = vmatprep.subr.mxu0 %v1052_v6  ;;  %1977 = vmatpush3.msra.mxu1 %v1220_v5  ;;  %v2841_v43 = vld [vmem:[%s2678_s26 + $0x50] sm:$0xff]  ;;  %v1209_v49 = vld [vmem:[%s3190_s6 + $0x20] sm:$0xff]  ;;  %v1208_v53 = vld [vmem:[%s3190_s6 + $0x18] sm:$0xff] }
  0x89   : > { %549 = vmatprep.mubr.f32.mxu0 %v2377_v4  ;;  %710 = vmatprep.mubr.f32.mxu1 %v2377_v4  ;;  %v2844_v44 = vld [vmem:[%s2455_s29 + $0x50] sm:$0xff]  ;;  %v1041_v50 = vld [vmem:[%s3189_s5 + $0x20] sm:$0xff]  ;;  %v1040_v54 = vld [vmem:[%s3189_s5 + $0x18] sm:$0xff] }
  0x8a   : > { %1921 = vmatpush3.msra.mxu0 %v1052_v6  ;;  %1978 = vmatprep.subr.mxu1 %v1219_v9  ;;  %v2873_v51 = vld [vmem:[%s2678_s26 + $0x60] sm:$0xff]  ;;  %v2889_v55 = vld [vmem:[%s2678_s26 + $0x68] sm:$0xff]  ;;  %v1207_v57 = vld [vmem:[%s3190_s6 + $0x10] sm:$0xff] }
  0x8b   : > { %550 = vmatmul.mubr.f32.gmra.mxu0 %v2697_v7  ;;  %711 = vmatmul.mubr.f32.gmra.mxu1 %v2700_v8  ;;  %v2876_v52 = vld [vmem:[%s2455_s29 + $0x60] sm:$0xff]  ;;  %v2892_v56 = vld [vmem:[%s2455_s29 + $0x68] sm:$0xff]  ;;  %v1039_v58 = vld [vmem:[%s3189_s5 + $0x10] sm:$0xff] }
  0x8c   : > { %1922 = vmatprep.subr.mxu0 %v1051_v10  ;;  %1979 = vmatpush3.msra.mxu1 %v1219_v9  ;;  %v413_v59 = vld [vmem:[%s2678_s26 + $0x70] sm:$0xff]  ;;  %v1206_v61 = vld [vmem:[%s3190_s6 + $0x8] sm:$0xff]  ;;  %v414_v63 = vld [vmem:[%s2678_s26 + $0x78] sm:$0xff] }
  0x8d   : > { %555 = vmatprep.mubr.f32.mxu0 %v2377_v4  ;;  %716 = vmatprep.mubr.f32.mxu1 %v2377_v4  ;;  %v396_v60 = vld [vmem:[%s2455_s29 + $0x70] sm:$0xff]  ;;  %v1038_v62 = vld [vmem:[%s3189_s5 + $0x8] sm:$0xff]  ;;  %v397_v0 = vld [vmem:[%s2455_s29 + $0x78] sm:$0xff] }
  0x8e   : > { %1923 = vmatpush3.msra.mxu0 %v1051_v10  ;;  %1980 = vmatprep.subr.mxu1 %v1218_v13  ;;  %v1205_v1 = vld [vmem:[%s3190_s6] sm:$0xff] }
  0x8f   : > { %556 = vmatmul.mubr.f32.gmra.mxu0 %v2713_v11  ;;  %717 = vmatmul.mubr.f32.gmra.mxu1 %v2716_v12  ;;  %v1037_v5 = vld [vmem:[%s3189_s5] sm:$0xff] }
  0x90   : > { %1924 = vmatprep.subr.mxu0 %v1050_v14  ;;  %1981 = vmatpush3.msra.mxu1 %v1218_v13  ;;  %v801_v6 = vld [vmem:[%s3191_s7] sm:$0x3] }
  0x91   : > { %561 = vmatprep.mubr.f32.mxu0 %v2377_v4  ;;  %722 = vmatprep.mubr.f32.mxu1 %v2377_v4 }
  0x92   : > { %1925 = vmatpush3.msra.mxu0 %v1050_v14  ;;  %1982 = vmatprep.subr.mxu1 %v1217_v17 }
  0x93   : > { %562 = vmatmul.mubr.f32.gmra.mxu0 %v2729_v15  ;;  %723 = vmatmul.mubr.f32.gmra.mxu1 %v2732_v16 }
  0x94   : > { %1926 = vmatprep.subr.mxu0 %v1049_v18  ;;  %1983 = vmatpush3.msra.mxu1 %v1217_v17 }
  0x95   : > { %567 = vmatprep.mubr.f32.mxu0 %v2377_v4  ;;  %728 = vmatprep.mubr.f32.mxu1 %v2377_v4 }
  0x96   : > { %1927 = vmatpush3.msra.mxu0 %v1049_v18  ;;  %1984 = vmatprep.subr.mxu1 %v1216_v21 }
  0x97   : > { %568 = vmatmul.mubr.f32.gmra.mxu0 %v2745_v19  ;;  %729 = vmatmul.mubr.f32.gmra.mxu1 %v2748_v20 }
  0x98   : > { %1928 = vmatprep.subr.mxu0 %v1048_v22  ;;  %1985 = vmatpush3.msra.mxu1 %v1216_v21 }
  0x99   : > { %573 = vmatprep.mubr.f32.mxu0 %v2377_v4  ;;  %734 = vmatprep.mubr.f32.mxu1 %v2377_v4 }
  0x9a   : > { %1929 = vmatpush3.msra.mxu0 %v1048_v22  ;;  %1986 = vmatprep.subr.mxu1 %v1215_v25 }
  0x9b   : > { %574 = vmatmul.mubr.f32.gmra.mxu0 %v2761_v23  ;;  %735 = vmatmul.mubr.f32.gmra.mxu1 %v2764_v24 }
  0x9c   : > { %1930 = vmatprep.subr.mxu0 %v1047_v26  ;;  %1987 = vmatpush3.msra.mxu1 %v1215_v25 }
  0x9d   : > { %579 = vmatprep.mubr.f32.mxu0 %v2377_v4  ;;  %740 = vmatprep.mubr.f32.mxu1 %v2377_v4 }
  0x9e   : > { %1931 = vmatpush3.msra.mxu0 %v1047_v26  ;;  %1988 = vmatprep.subr.mxu1 %v1214_v29 }
  0x9f   : > { %580 = vmatmul.mubr.f32.gmra.mxu0 %v2777_v27  ;;  %741 = vmatmul.mubr.f32.gmra.mxu1 %v2780_v28 }
  0xa0   : > { %1932 = vmatprep.subr.mxu0 %v1046_v30  ;;  %1989 = vmatpush3.msra.mxu1 %v1214_v29 }
  0xa1   : > { %585 = vmatprep.mubr.f32.mxu0 %v2377_v4  ;;  %746 = vmatprep.mubr.f32.mxu1 %v2377_v4 }
  0xa2   : > { %1933 = vmatpush3.msra.mxu0 %v1046_v30  ;;  %1990 = vmatprep.subr.mxu1 %v1213_v33 }
  0xa3   : > { %586 = vmatmul.mubr.f32.gmra.mxu0 %v2793_v31  ;;  %747 = vmatmul.mubr.f32.gmra.mxu1 %v2796_v32 }
  0xa4   : > { %1934 = vmatprep.subr.mxu0 %v1045_v34  ;;  %1991 = vmatpush3.msra.mxu1 %v1213_v33 }
  0xa5   : > { %591 = vmatprep.mubr.f32.mxu0 %v2377_v4  ;;  %752 = vmatprep.mubr.f32.mxu1 %v2377_v4 }
  0xa6   : > { %1935 = vmatpush3.msra.mxu0 %v1045_v34  ;;  %1992 = vmatprep.subr.mxu1 %v1212_v37 }
  0xa7   : > { %592 = vmatmul.mubr.f32.gmra.mxu0 %v2809_v35  ;;  %753 = vmatmul.mubr.f32.gmra.mxu1 %v2812_v36 }
  0xa8   : > { %1936 = vmatprep.subr.mxu0 %v1044_v38  ;;  %1993 = vmatpush3.msra.mxu1 %v1212_v37 }
  0xa9   : > { %597 = vmatprep.mubr.f32.mxu0 %v2377_v4  ;;  %758 = vmatprep.mubr.f32.mxu1 %v2377_v4 }
  0xaa   : > { %1937 = vmatpush3.msra.mxu0 %v1044_v38  ;;  %1994 = vmatprep.subr.mxu1 %v1211_v41 }
  0xab   : > { %598 = vmatmul.mubr.f32.gmra.mxu0 %v2825_v39  ;;  %759 = vmatmul.mubr.f32.gmra.mxu1 %v2828_v40 }
  0xac   : > { %1938 = vmatprep.subr.mxu0 %v1043_v42  ;;  %1995 = vmatpush3.msra.mxu1 %v1211_v41 }
  0xad   : > { %603 = vmatprep.mubr.f32.mxu0 %v2377_v4  ;;  %764 = vmatprep.mubr.f32.mxu1 %v2377_v4 }
  0xae   : > { %1939 = vmatpush3.msra.mxu0 %v1043_v42  ;;  %1996 = vmatprep.subr.mxu1 %v1210_v45 }
  0xaf   : > { %604 = vmatmul.mubr.f32.gmra.mxu0 %v2841_v43  ;;  %765 = vmatmul.mubr.f32.gmra.mxu1 %v2844_v44 }
  0xb0   : > { %1940 = vmatprep.subr.mxu0 %v1042_v46  ;;  %1997 = vmatpush3.msra.mxu1 %v1210_v45 }
  0xb1   : > { %609 = vmatprep.mubr.f32.mxu0 %v2377_v4  ;;  %770 = vmatprep.mubr.f32.mxu1 %v2377_v4 }
  0xb2   : > { %1941 = vmatpush3.msra.mxu0 %v1042_v46  ;;  %1998 = vmatprep.subr.mxu1 %v1209_v49 }
  0xb3   : > { %610 = vmatmul.mubr.f32.gmra.mxu0 %v2857_v47  ;;  %771 = vmatmul.mubr.f32.gmra.mxu1 %v2860_v48 }
  0xb4   : > { %1942 = vmatprep.subr.mxu0 %v1041_v50  ;;  %1999 = vmatpush3.msra.mxu1 %v1209_v49 }
  0xb5   : > { %615 = vmatprep.mubr.f32.mxu0 %v2377_v4  ;;  %776 = vmatprep.mubr.f32.mxu1 %v2377_v4 }
  0xb6   : > { %1943 = vmatpush3.msra.mxu0 %v1041_v50  ;;  %2000 = vmatprep.subr.mxu1 %v1208_v53 }
  0xb7   : > { %616 = vmatmul.mubr.f32.gmra.mxu0 %v2873_v51  ;;  %777 = vmatmul.mubr.f32.gmra.mxu1 %v2876_v52 }
  0xb8   : > { %1944 = vmatprep.subr.mxu0 %v1040_v54  ;;  %2001 = vmatpush3.msra.mxu1 %v1208_v53 }
  0xb9   : > { %621 = vmatprep.mubr.f32.mxu0 %v2377_v4  ;;  %782 = vmatprep.mubr.f32.mxu1 %v2377_v4 }
  0xba   : > { %1945 = vmatpush3.msra.mxu0 %v1040_v54  ;;  %2002 = vmatprep.subr.mxu1 %v1207_v57 }
  0xbb   : > { %622 = vmatmul.mubr.f32.gmra.mxu0 %v2889_v55  ;;  %783 = vmatmul.mubr.f32.gmra.mxu1 %v2892_v56 }
  0xbc   : > { %1946 = vmatprep.subr.mxu0 %v1039_v58  ;;  %2003 = vmatpush3.msra.mxu1 %v1207_v57 }
  0xbd   : > { %627 = vmatprep.mubr.f32.mxu0 %v2377_v4  ;;  %788 = vmatprep.mubr.f32.mxu1 %v2377_v4 }
  0xbe   : > { %1947 = vmatpush3.msra.mxu0 %v1039_v58  ;;  %2004 = vmatprep.subr.mxu1 %v1206_v61 }
  0xbf   : > { %628 = vmatmul.mubr.f32.gmra.mxu0 %v413_v59  ;;  %789 = vmatmul.mubr.f32.gmra.mxu1 %v396_v60 }
  0xc0   : > { %1948 = vmatprep.subr.mxu0 %v1038_v62  ;;  %2005 = vmatpush3.msra.mxu1 %v1206_v61 }
  0xc1   : > { %633 = vmatprep.mubr.f32.mxu0 %v2377_v4  ;;  %794 = vmatprep.mubr.f32.mxu1 %v2377_v4 }
  0xc2   : > { %1949 = vmatpush3.msra.mxu0 %v1038_v62  ;;  %2006 = vmatprep.subr.mxu1 %v1205_v1 }
  0xc3   : > { %634 = vmatmul.mubr.f32.gmra.mxu0 %v414_v63  ;;  %795 = vmatmul.mubr.f32.gmra.mxu1 %v397_v0 }
  0xc4   : > { %1950 = vmatprep.subr.mxu0 %v1037_v5  ;;  %2007 = vmatpush3.msra.mxu1 %v1205_v1 }
  0xc5   : > { %1951 = vmatpush3.msra.mxu0 %v1037_v5  ;;  %2008 = vmatprep.mubr.f32.mxu1 %v2681_v2  ;;  %v803_v2 = vlaneseq }
  0xc6   : > { %1952 = vmatprep.mubr.f32.mxu0 %v2684_v3 }
  0xc7   : > { %2009 = vmatmul.mubr.f32.vlgmr.msra.gmra.mxu1 %v2697_v7  ;;  %1953 = vmatmul.mubr.f32.vlgmr.msra.gmra.mxu0 %v2700_v8  ;;  %v804_v3 = vshrl.u32 %v803_v2, 7 }
  0xc8   : > { %2011 = vmatprep.mubr.f32.mxu1 %v2713_v11  ;;  %1955 = vmatprep.mubr.f32.mxu0 %v2716_v12 }
  0xc9   : > { %v805_v4 = vsub.s32 0, %v804_v3  ;;  %v809_v7 = vsub.s32 1, %v804_v3 }
  0xcb   : > { %2012 = vmatmul.mubr.f32.gmra.mxu1 %v2729_v15  ;;  %1956 = vmatmul.mubr.f32.gmra.mxu0 %v2732_v16  ;;  %v2955_v8 = vrot.slane %v801_v6, %v805_v4  ;;  %v2957_v12 = vrot.slane %v801_v6, %v809_v7 }
  0xcc   : > { %2014 = vmatprep.mubr.f32.mxu1 %v2745_v19  ;;  %1958 = vmatprep.mubr.f32.mxu0 %v2748_v20 }
  0xcf   : > { %2015 = vmatmul.mubr.f32.gmra.mxu1 %v2761_v23  ;;  %1959 = vmatmul.mubr.f32.gmra.mxu0 %v2764_v24 }
  0xd0   : > { %2017 = vmatprep.mubr.f32.mxu1 %v2777_v27  ;;  %1961 = vmatprep.mubr.f32.mxu0 %v2780_v28 }
  0xd3   : > { %2018 = vmatmul.mubr.f32.gmra.mxu1 %v2793_v31  ;;  %1962 = vmatmul.mubr.f32.gmra.mxu0 %v2796_v32 }
  0xd4   : > { %2020 = vmatprep.mubr.f32.mxu1 %v2809_v35  ;;  %1964 = vmatprep.mubr.f32.mxu0 %v2812_v36 }
  0xd7   : > { %2021 = vmatmul.mubr.f32.gmra.mxu1 %v2825_v39  ;;  %1965 = vmatmul.mubr.f32.gmra.mxu0 %v2828_v40 }
  0xd8   : > { %2023 = vmatprep.mubr.f32.mxu1 %v2841_v43  ;;  %1967 = vmatprep.mubr.f32.mxu0 %v2844_v44 }
  0xdb   : > { %2024 = vmatmul.mubr.f32.gmra.mxu1 %v2857_v47  ;;  %1968 = vmatmul.mubr.f32.gmra.mxu0 %v2860_v48 }
  0xdc   : > { %2026 = vmatprep.mubr.f32.mxu1 %v2873_v51  ;;  %1970 = vmatprep.mubr.f32.mxu0 %v2876_v52 }
  0xdf   : > { %2027 = vmatmul.mubr.f32.gmra.mxu1 %v2889_v55  ;;  %1971 = vmatmul.mubr.f32.gmra.mxu0 %v2892_v56 }
  0xe0   : > { %2029 = vmatprep.mubr.f32.mxu1 %v413_v59  ;;  %1973 = vmatprep.mubr.f32.mxu0 %v396_v60 }
  0xe3   : > { %2030 = vmatmul.mubr.f32.gmra.mxu1 %v414_v63  ;;  %1974 = vmatmul.mubr.f32.gmra.mxu0 %v397_v0 }
 0x146   : > { %v545_v9 = vpop.f32.mrf.mxu0 }
 0x147   : > { %v706_v10 = vpop.f32.mrf.mxu1 }
 0x148   : > { %v707_v11 = vadd.f32 %v706_v10, %v545_v9  ;;  %v547_v13 = vpop.f32.mrf.mxu0 }
 0x149   : > { %v708_v14 = vpop.f32.mrf.mxu1 }
 0x14a   : > { %v813_v15 = vadd.f32 %v2955_v8, %v707_v11  ;;  %v709_v16 = vadd.f32 %v708_v14, %v547_v13 }
 0x14b   : > { %v551_v17 = vpop.f32.mrf.mxu0  ;;  %v712_v18 = vpop.f32.mrf.mxu1 }
 0x14c   : > { %v1814_v19 = vmul.f32 -1.442695, %v813_v15  ;;  %v814_v20 = vadd.f32 %v2957_v12, %v709_v16  ;;  %v713_v21 = vadd.f32 %v712_v18, %v551_v17 }
 0x14d   : > { %v553_v22 = vpop.f32.mrf.mxu0  ;;  %v714_v23 = vpop.f32.mrf.mxu1 }
 0x14e   : > { %2106 = vpow2.f32 %v1814_v19  ;;  %v1830_v24 = vmul.f32 -1.442695, %v814_v20  ;;  %v815_v25 = vadd.f32 %v2955_v8, %v713_v21  ;;  %v715_v26 = vadd.f32 %v714_v23, %v553_v22 }
 0x14f   : > { %v557_v27 = vpop.f32.mrf.mxu0  ;;  %v718_v28 = vpop.f32.mrf.mxu1 }
 0x150   : > { %2108 = vpow2.f32 %v1830_v24  ;;  %v1815_v29 = vmul.f32 -1.442695, %v815_v25  ;;  %v816_v30 = vadd.f32 %v2957_v12, %v715_v26  ;;  %v719_v31 = vadd.f32 %v718_v28, %v557_v27 }
 0x151   : > { %v559_v32 = vpop.f32.mrf.mxu0  ;;  %v720_v33 = vpop.f32.mrf.mxu1 }
 0x152   : > { %2110 = vpow2.f32 %v1815_v29  ;;  %v1831_v34 = vmul.f32 -1.442695, %v816_v30  ;;  %v817_v35 = vadd.f32 %v2955_v8, %v719_v31  ;;  %v721_v36 = vadd.f32 %v720_v33, %v559_v32 }
 0x153   : > { %v563_v37 = vpop.f32.mrf.mxu0  ;;  %v724_v38 = vpop.f32.mrf.mxu1 }
 0x154   : > { %2112 = vpow2.f32 %v1831_v34  ;;  %v1816_v39 = vmul.f32 -1.442695, %v817_v35  ;;  %v818_v40 = vadd.f32 %v2957_v12, %v721_v36  ;;  %v725_v41 = vadd.f32 %v724_v38, %v563_v37 }
 0x155   : > { %v565_v42 = vpop.f32.mrf.mxu0  ;;  %v726_v43 = vpop.f32.mrf.mxu1 }
 0x156   : > { %2114 = vpow2.f32 %v1816_v39  ;;  %v1832_v44 = vmul.f32 -1.442695, %v818_v40  ;;  %v819_v45 = vadd.f32 %v2955_v8, %v725_v41  ;;  %v727_v46 = vadd.f32 %v726_v43, %v565_v42 }
 0x157   : > { %v569_v47 = vpop.f32.mrf.mxu0  ;;  %v730_v48 = vpop.f32.mrf.mxu1 }
 0x158   : > { %2116 = vpow2.f32 %v1832_v44  ;;  %v1817_v49 = vmul.f32 -1.442695, %v819_v45  ;;  %v820_v50 = vadd.f32 %v2957_v12, %v727_v46  ;;  %v731_v51 = vadd.f32 %v730_v48, %v569_v47 }
 0x159   : > { %v571_v52 = vpop.f32.mrf.mxu0  ;;  %v732_v53 = vpop.f32.mrf.mxu1 }
 0x15a   : > { %2118 = vpow2.f32 %v1817_v49  ;;  %v1833_v54 = vmul.f32 -1.442695, %v820_v50  ;;  %v821_v55 = vadd.f32 %v2955_v8, %v731_v51  ;;  %v733_v56 = vadd.f32 %v732_v53, %v571_v52 }
 0x15b   : > { %v2107_v57 = vpop.eup %2106  ;;  %v575_v58 = vpop.f32.mrf.mxu0 }
 0x15c   : > { %v736_v59 = vpop.f32.mrf.mxu1  ;;  %2120 = vpow2.f32 %v1833_v54  ;;  %v1818_v60 = vmul.f32 -1.442695, %v821_v55  ;;  %v822_v61 = vadd.f32 %v2957_v12, %v733_v56  ;;  %v893_v5 = vadd.f32 1.0, %v2107_v57 }
 0x15d   : > { %v2109_v62 = vpop.eup %2108  ;;  %v737_v63 = vadd.f32 %v736_v59, %v575_v58  ;;  %v577_v0 = vpop.f32.mrf.mxu0 }
 0x15e   : > { %v738_v1 = vpop.f32.mrf.mxu1  ;;  %v1834_v2 = vmul.f32 -1.442695, %v822_v61  ;;  %2122 = vpow2.f32 %v1818_v60  ;;  %v989_v10 = vadd.f32 1.0, %v2109_v62 }
 0x15f   : > { %v739_v3 = vadd.f32 %v738_v1, %v577_v0  ;;  %v2111_v4 = vpop.eup %2110  ;;  %v823_v6 = vadd.f32 %v2955_v8, %v737_v63  ;;  %v581_v7 = vpop.f32.mrf.mxu0 }
 0x160   : > { %v742_v9 = vpop.f32.mrf.mxu1  ;;  %2124 = vpow2.f32 %v1834_v2  ;;  %v894_v18 = vadd.f32 1.0, %v2111_v4 }
 0x161   : > { %v824_v11 = vadd.f32 %v2957_v12, %v739_v3  ;;  %v743_v13 = vadd.f32 %v742_v9, %v581_v7  ;;  %v2113_v14 = vpop.eup %2112  ;;  %v1819_v15 = vmul.f32 -1.442695, %v823_v6  ;;  %v583_v16 = vpop.f32.mrf.mxu0  ;;  %2126 = vrcp.f32 %v893_v5 }
 0x162   : > { %v744_v17 = vpop.f32.mrf.mxu1  ;;  %v990_v25 = vadd.f32 1.0, %v2113_v14 }
 0x163   : > { %v1835_v19 = vmul.f32 -1.442695, %v824_v11  ;;  %v825_v20 = vadd.f32 %v2955_v8, %v743_v13  ;;  %v2115_v21 = vpop.eup %2114  ;;  %2128 = vpow2.f32 %v1819_v15  ;;  %v745_v22 = vadd.f32 %v744_v17, %v583_v16  ;;  %v587_v23 = vpop.f32.mrf.mxu0 }
 0x164   : > { %v748_v24 = vpop.f32.mrf.mxu1  ;;  %2130 = vrcp.f32 %v989_v10  ;;  %v895_v32 = vadd.f32 1.0, %v2115_v21 }
 0x165   : > { %v1820_v26 = vmul.f32 -1.442695, %v825_v20  ;;  %v749_v27 = vadd.f32 %v748_v24, %v587_v23  ;;  %v2117_v28 = vpop.eup %2116  ;;  %2132 = vpow2.f32 %v1835_v19  ;;  %v826_v29 = vadd.f32 %v2957_v12, %v745_v22  ;;  %v589_v30 = vpop.f32.mrf.mxu0 }
 0x166   : > { %v750_v31 = vpop.f32.mrf.mxu1  ;;  %2134 = vrcp.f32 %v894_v18  ;;  %v991_v39 = vadd.f32 1.0, %v2117_v28 }
 0x167   : > { %v827_v33 = vadd.f32 %v2955_v8, %v749_v27  ;;  %v751_v34 = vadd.f32 %v750_v31, %v589_v30  ;;  %v2119_v35 = vpop.eup %2118  ;;  %2136 = vpow2.f32 %v1820_v26  ;;  %v1836_v36 = vmul.f32 -1.442695, %v826_v29  ;;  %v593_v37 = vpop.f32.mrf.mxu0 }
 0x168   : > { %v754_v38 = vpop.f32.mrf.mxu1  ;;  %2138 = vrcp.f32 %v990_v25  ;;  %v896_v46 = vadd.f32 1.0, %v2119_v35 }
 0x169   : > { %v1821_v40 = vmul.f32 -1.442695, %v827_v33  ;;  %v828_v41 = vadd.f32 %v2957_v12, %v751_v34  ;;  %v2121_v42 = vpop.eup %2120  ;;  %2140 = vpow2.f32 %v1836_v36  ;;  %v755_v43 = vadd.f32 %v754_v38, %v593_v37  ;;  %v595_v44 = vpop.f32.mrf.mxu0 }
 0x16a   : > { %v756_v45 = vpop.f32.mrf.mxu1  ;;  %2142 = vrcp.f32 %v895_v32  ;;  %v992_v49 = vadd.f32 1.0, %v2121_v42 }
 0x16b   : > { %v1837_v47 = vmul.f32 -1.442695, %v828_v41  ;;  %v757_v48 = vadd.f32 %v756_v45, %v595_v44  ;;  %2144 = vpow2.f32 %v1821_v40  ;;  %v829_v50 = vadd.f32 %v2955_v8, %v755_v43  ;;  %v599_v51 = vpop.f32.mrf.mxu0  ;;  %v2123_v53 = vpop.eup %2122 }
 0x16c   : > { %v760_v52 = vpop.f32.mrf.mxu1  ;;  %2146 = vrcp.f32 %v991_v39  ;;  %v897_v56 = vadd.f32 1.0, %v2123_v53 }
 0x16d   : > { %v830_v54 = vadd.f32 %v2957_v12, %v757_v48  ;;  %v761_v55 = vadd.f32 %v760_v52, %v599_v51  ;;  %2148 = vpow2.f32 %v1837_v47  ;;  %v1822_v57 = vmul.f32 -1.442695, %v829_v50  ;;  %v601_v58 = vpop.f32.mrf.mxu0  ;;  %v2125_v60 = vpop.eup %2124 }
 0x16e   : > { %v762_v59 = vpop.f32.mrf.mxu1  ;;  %2150 = vrcp.f32 %v896_v46  ;;  %v2978_v0 = vpop.eup %2126  ;;  %v993_v1 = vadd.f32 1.0, %v2125_v60 }
 0x16f   : > { %v1838_v61 = vmul.f32 -1.442695, %v830_v54  ;;  %v831_v62 = vadd.f32 %v2955_v8, %v761_v55  ;;  %v763_v63 = vadd.f32 %v762_v59, %v601_v58  ;;  %2152 = vrcp.f32 %v992_v49  ;;  %v605_v5 = vpop.f32.mrf.mxu0 }
 0x170   : > { %v766_v2 = vpop.f32.mrf.mxu1  ;;  %v2129_v3 = vpop.eup %2128  ;;  %2154 = vpow2.f32 %v1822_v57 }
 0x171   : > { %v1823_v4 = vmul.f32 -1.442695, %v831_v62  ;;  %v832_v6 = vadd.f32 %v2957_v12, %v763_v63  ;;  %v767_v7 = vadd.f32 %v766_v2, %v605_v5  ;;  %v2981_v9 = vpop.eup %2130  ;;  %2156 = vrcp.f32 %v897_v56  ;;  %v607_v11 = vpop.f32.mrf.mxu0 }
 0x172   : > { %v898_v10 = vadd.f32 1.0, %v2129_v3  ;;  %v768_v13 = vpop.f32.mrf.mxu1  ;;  %v2133_v14 = vpop.eup %2132  ;;  %2158 = vpow2.f32 %v1838_v61 }
 0x173   : > { %v1839_v15 = vmul.f32 -1.442695, %v832_v6  ;;  %v833_v16 = vadd.f32 %v2955_v8, %v767_v7  ;;  %v769_v17 = vadd.f32 %v768_v13, %v607_v11  ;;  %v2984_v18 = vpop.eup %2134  ;;  %2160 = vrcp.f32 %v993_v1  ;;  %v611_v20 = vpop.f32.mrf.mxu0 }
 0x174   : > { %v994_v19 = vadd.f32 1.0, %v2133_v14  ;;  %v772_v21 = vpop.f32.mrf.mxu1  ;;  %v2137_v22 = vpop.eup %2136  ;;  %2162 = vpow2.f32 %v1823_v4 }
 0x175   : > { %v1824_v23 = vmul.f32 -1.442695, %v833_v16  ;;  %v834_v24 = vadd.f32 %v2957_v12, %v769_v17  ;;  %v773_v25 = vadd.f32 %v772_v21, %v611_v20  ;;  %v2987_v26 = vpop.eup %2138  ;;  %2164 = vrcp.f32 %v898_v10  ;;  %v613_v28 = vpop.f32.mrf.mxu0 }
 0x176   : > { %v899_v27 = vadd.f32 1.0, %v2137_v22  ;;  %v774_v29 = vpop.f32.mrf.mxu1  ;;  %v2141_v30 = vpop.eup %2140  ;;  %2166 = vpow2.f32 %v1839_v15 }
 0x177   : > { %v1840_v31 = vmul.f32 -1.442695, %v834_v24  ;;  %v835_v32 = vadd.f32 %v2955_v8, %v773_v25  ;;  %v775_v33 = vadd.f32 %v774_v29, %v613_v28  ;;  %v2990_v34 = vpop.eup %2142  ;;  %2168 = vrcp.f32 %v994_v19  ;;  %v617_v36 = vpop.f32.mrf.mxu0 }
 0x178   : > { %v995_v35 = vadd.f32 1.0, %v2141_v30  ;;  %v778_v37 = vpop.f32.mrf.mxu1  ;;  %v2145_v38 = vpop.eup %2144  ;;  %2170 = vpow2.f32 %v1824_v23 }
 0x179   : > { %v1825_v39 = vmul.f32 -1.442695, %v835_v32  ;;  %v836_v40 = vadd.f32 %v2957_v12, %v775_v33  ;;  %v779_v41 = vadd.f32 %v778_v37, %v617_v36  ;;  %v2993_v42 = vpop.eup %2146  ;;  %2172 = vrcp.f32 %v899_v27  ;;  %v619_v44 = vpop.f32.mrf.mxu0  ;;  %v3016_v36 = vld [vmem:[%s3193_s9] ss:$0 sm:$0xff] }
 0x17a   : > { %v900_v43 = vadd.f32 1.0, %v2145_v38  ;;  %v780_v45 = vpop.f32.mrf.mxu1  ;;  %v2149_v46 = vpop.eup %2148  ;;  %2174 = vpow2.f32 %v1840_v31 }
 0x17b   : > { %v1841_v47 = vmul.f32 -1.442695, %v836_v40  ;;  %v837_v48 = vadd.f32 %v2955_v8, %v779_v41  ;;  %v781_v49 = vadd.f32 %v780_v45, %v619_v44  ;;  %v2996_v50 = vpop.eup %2150  ;;  %2176 = vrcp.f32 %v995_v35  ;;  %v623_v52 = vpop.f32.mrf.mxu0  ;;  %v3023_v41 = vld [vmem:[%s3192_s8] ss:$0 sm:$0xff] }
 0x17c   : > { %v996_v51 = vadd.f32 1.0, %v2149_v46  ;;  %v784_v53 = vpop.f32.mrf.mxu1  ;;  %v2998_v54 = vpop.eup %2152  ;;  %2178 = vpow2.f32 %v1825_v39 }
 0x17d   : > { %v1826_v55 = vmul.f32 -1.442695, %v837_v48  ;;  %v838_v56 = vadd.f32 %v2957_v12, %v781_v49  ;;  %v785_v57 = vadd.f32 %v784_v53, %v623_v52  ;;  %v2155_v58 = vpop.eup %2154  ;;  %2180 = vrcp.f32 %v900_v43  ;;  %v625_v59 = vpop.f32.mrf.mxu0 }
 0x17e   : > { %v786_v60 = vpop.f32.mrf.mxu1  ;;  %v3001_v61 = vpop.eup %2156  ;;  %v901_v62 = vadd.f32 1.0, %v2155_v58  ;;  %2182 = vpow2.f32 %v1841_v47 }
 0x17f   : > { %v1842_v63 = vmul.f32 -1.442695, %v838_v56  ;;  %v839_v1 = vadd.f32 %v2955_v8, %v785_v57  ;;  %v2159_v5 = vpop.eup %2158  ;;  %2184 = vpow2.f32 %v1826_v55  ;;  %v787_v2 = vadd.f32 %v786_v60, %v625_v59  ;;  %v629_v3 = vpop.f32.mrf.mxu0 }
 0x180   : > { %v790_v4 = vpop.f32.mrf.mxu1  ;;  %v3004_v6 = vpop.eup %2160  ;;  %2186 = vrcp.f32 %v996_v51  ;;  %v997_v7 = vadd.f32 1.0, %v2159_v5 }
 0x181   : > { %v1827_v10 = vmul.f32 -1.442695, %v839_v1  ;;  %v791_v11 = vadd.f32 %v790_v4, %v629_v3  ;;  %v2163_v13 = vpop.eup %2162  ;;  %2188 = vrcp.f32 %v901_v62  ;;  %v840_v14 = vadd.f32 %v2957_v12, %v787_v2  ;;  %v631_v15 = vpop.f32.mrf.mxu0 }
 0x182   : > { %v792_v16 = vpop.f32.mrf.mxu1  ;;  %v3007_v17 = vpop.eup %2164  ;;  %v902_v19 = vadd.f32 1.0, %v2163_v13  ;;  %2190 = vpow2.f32 %v1842_v63 }
 0x183   : > { %v841_v20 = vadd.f32 %v2955_v8, %v791_v11  ;;  %v793_v21 = vadd.f32 %v792_v16, %v631_v15  ;;  %v2167_v22 = vpop.eup %2166  ;;  %2192 = vpow2.f32 %v1827_v10  ;;  %v1843_v23 = vmul.f32 -1.442695, %v840_v14  ;;  %v635_v24 = vpop.f32.mrf.mxu0 }
 0x184   : > { %v796_v25 = vpop.f32.mrf.mxu1  ;;  %v3010_v27 = vpop.eup %2168  ;;  %2194 = vrcp.f32 %v997_v7  ;;  %v998_v28 = vadd.f32 1.0, %v2167_v22 }
 0x185   : > { %v1828_v29 = vmul.f32 -1.442695, %v841_v20  ;;  %v842_v30 = vadd.f32 %v2957_v12, %v793_v21  ;;  %v2171_v31 = vpop.eup %2170  ;;  %2196 = vrcp.f32 %v902_v19  ;;  %v797_v32 = vadd.f32 %v796_v25, %v635_v24  ;;  %v637_v33 = vpop.f32.mrf.mxu0 }
 0x186   : > { %v798_v35 = vpop.f32.mrf.mxu1  ;;  %v3018_v37 = vpop.eup %2172  ;;  %v903_v38 = vadd.f32 1.0, %v2171_v31  ;;  %2198 = vpow2.f32 %v1843_v23 }
 0x187   : > { %v1844_v39 = vmul.f32 -1.442695, %v842_v30  ;;  %v799_v40 = vadd.f32 %v798_v35, %v637_v33  ;;  %v2175_v43 = vpop.eup %2174  ;;  %2200 = vpow2.f32 %v1828_v29  ;;  %v843_v44 = vadd.f32 %v2955_v8, %v797_v32  ;;  %v1954_v46 = vpop.f32.mrf.mxu0 }
 0x188   : > { %v2010_v45 = vpop.f32.mrf.mxu1  ;;  %v3026_v47 = vpop.eup %2176  ;;  %2202 = vrcp.f32 %v998_v28  ;;  %v999_v48 = vadd.f32 1.0, %v2175_v43  ;;  %v1132_v55 = vadd.f32 %v1954_v46, %v3023_v41  ;;  %v1421_v32 = vsub.f32 1.0, %v2981_v9  ;;  %v2266_v46 = vld [vmem:[%s2678_s26] sm:$0xff] }
 0x189   : > { %v844_v49 = vadd.f32 %v2957_v12, %v799_v40  ;;  %v1300_v51 = vadd.f32 %v2010_v45, %v3016_v36  ;;  %v2179_v52 = vpop.eup %2178  ;;  %2204 = vrcp.f32 %v903_v38  ;;  %v1829_v53 = vmul.f32 -1.442695, %v843_v44  ;;  %v1126_v57 = vpop.f32.mrf.mxu0 }
 0x18a   : > { %v1294_v56 = vpop.f32.mrf.mxu1  ;;  %v3031_v58 = vpop.eup %2180  ;;  %v904_v8 = vadd.f32 1.0, %v2179_v52  ;;  %2206 = vpow2.f32 %v1844_v39  ;;  %v1127_v11 = vadd.f32 %v3023_v41, %v1126_v57 }
 0x18b   : > { %v1374_v59 = vmul.f32 %v2984_v18, %v1300_v51  ;;  %v2183_v60 = vpop.eup %2182  ;;  %2208 = vpow2.f32 %v1829_v53  ;;  %v1845_v62 = vmul.f32 -1.442695, %v844_v49  ;;  %v1295_v12 = vadd.f32 %v3016_v36, %v1294_v56  ;;  %v1957_v1 = vpop.f32.mrf.mxu0 }
 0x18c   : > { %v2013_v63 = vpop.f32.mrf.mxu1  ;;  %v2185_v5 = vpop.eup %2184  ;;  %2210 = vrcp.f32 %v999_v48  ;;  %v1000_v7 = vadd.f32 1.0, %v2183_v60  ;;  %v1142_v18 = vadd.f32 %v1957_v1, %v3023_v41  ;;  %v3056_v48 = vmul.f32 %v2266_v46, %v2981_v9 }
 0x18d   : > { %v1390_v2 = vadd.f32 %v1374_v59, %v1132_v55  ;;  %v1310_v3 = vadd.f32 %v2013_v63, %v3016_v36  ;;  %v3036_v4 = vpop.eup %2186  ;;  %v1373_v10 = vmul.f32 %v2978_v0, %v1295_v12  ;;  %v1136_v14 = vpop.f32.mrf.mxu0  ;;  %2212 = vrcp.f32 %v904_v8 }
 0x18e   : > { %v1304_v13 = vpop.f32.mrf.mxu1  ;;  %v3041_v15 = vpop.eup %2188  ;;  %v905_v21 = vadd.f32 1.0, %v2185_v5  ;;  %2214 = vpow2.f32 %v1845_v62  ;;  %v1137_v23 = vadd.f32 %v3023_v41, %v1136_v14  ;;  %v1422_v59 = vsub.f32 1.0, %v2987_v26 }
 0x18f   : > { %v1376_v16 = vmul.f32 %v2996_v50, %v1310_v3  ;;  %v1305_v19 = vadd.f32 %v3016_v36, %v1304_v13  ;;  %v2191_v20 = vpop.eup %2190  ;;  %v1389_v22 = vadd.f32 %v1373_v10, %v1127_v11  ;;  %v1960_v24 = vpop.f32.mrf.mxu0  ;;  %2216 = vtanh.f32 %v1390_v2  ;;  %v2267_v3 = vld [vmem:[%s2678_s26 + $0x8] sm:$0xff] }
 0x190   : > { %v2016_v0 = vpop.f32.mrf.mxu1  ;;  %v2193_v25 = vpop.eup %2192  ;;  %2218 = vrcp.f32 %v1000_v7  ;;  %v1152_v33 = vadd.f32 %v1960_v24, %v3023_v41  ;;  %v1001_v45 = vadd.f32 1.0, %v2191_v20  ;;  %v1454_v7 = vmul.f32 %v2267_v3, %v2987_v26 }
 0x191   : > { %v1392_v28 = vadd.f32 %v1376_v16, %v1142_v18  ;;  %v1375_v29 = vmul.f32 %v2990_v34, %v1305_v19  ;;  %v1320_v30 = vadd.f32 %v2016_v0, %v3016_v36  ;;  %v3048_v31 = vpop.eup %2194  ;;  %v906_v50 = vadd.f32 1.0, %v2193_v25  ;;  %v1146_v38 = vpop.f32.mrf.mxu0 }
 0x192   : > { %v1314_v35 = vpop.f32.mrf.mxu1  ;;  %v2197_v39 = vpop.eup %2196  ;;  %2220 = vtanh.f32 %v1389_v22  ;;  %v1147_v49 = vadd.f32 %v3023_v41, %v1146_v38  ;;  %v1423_v10 = vsub.f32 1.0, %v2993_v42 }
 0x193   : > { %v1391_v40 = vadd.f32 %v1375_v29, %v1137_v23  ;;  %v1378_v43 = vmul.f32 %v3007_v17, %v1320_v30  ;;  %v1315_v34 = vadd.f32 %v3016_v36, %v1314_v35  ;;  %v2199_v44 = vpop.eup %2198  ;;  %2222 = vrcp.f32 %v905_v21  ;;  %v1963_v52 = vpop.f32.mrf.mxu0  ;;  %v2268_v30 = vld [vmem:[%s2678_s26 + $0x10] sm:$0xff] }
 0x194   : > { %v2019_v51 = vpop.f32.mrf.mxu1  ;;  %v2201_v53 = vpop.eup %2200  ;;  %2224 = vtanh.f32 %v1392_v28  ;;  %v1162_v60 = vadd.f32 %v1963_v52, %v3023_v41  ;;  %v1002_v21 = vadd.f32 1.0, %v2199_v44 }
 0x195   : > { %v1394_v55 = vadd.f32 %v1378_v43, %v1152_v33  ;;  %v1377_v56 = vmul.f32 %v3001_v61, %v1315_v34  ;;  %v1330_v17 = vadd.f32 %v2019_v51, %v3016_v36  ;;  %v3061_v57 = vpop.eup %2202  ;;  %2226 = vrcp.f32 %v906_v50  ;;  %v1156_v12 = vpop.f32.mrf.mxu0 }
 0x196   : > { %v907_v8 = vadd.f32 1.0, %v2201_v53  ;;  %v1324_v62 = vpop.f32.mrf.mxu1  ;;  %v3065_v63 = vpop.eup %2204  ;;  %2228 = vtanh.f32 %v1391_v40  ;;  %v1157_v11 = vadd.f32 %v3023_v41, %v1156_v12  ;;  %v3082_v50 = vmul.f32 %v2268_v30, %v2993_v42 }
 0x197   : > { %v1393_v1 = vadd.f32 %v1377_v56, %v1147_v49  ;;  %v1380_v5 = vmul.f32 %v3031_v58, %v1330_v17  ;;  %v1325_v61 = vadd.f32 %v3016_v36, %v1324_v62  ;;  %v2207_v2 = vpop.eup %2206  ;;  %2230 = vrcp.f32 %v1001_v45  ;;  %v1966_v13 = vpop.f32.mrf.mxu0  ;;  %v2269_v45 = vld [vmem:[%s2678_s26 + $0x18] sm:$0xff]  ;;  %v2270_v62 = vld [vmem:[%s2678_s26 + $0x20] sm:$0xff] }
 0x198   : > { %v2022_v18 = vpop.f32.mrf.mxu1  ;;  %v2209_v14 = vpop.eup %2208  ;;  %2232 = vtanh.f32 %v1394_v55  ;;  %v1172_v26 = vadd.f32 %v1966_v13, %v3023_v41  ;;  %v1456_v46 = vmul.f32 %v2269_v45, %v2998_v54  ;;  %v1425_v49 = vsub.f32 1.0, %v3004_v6 }
 0x199   : > { %v1396_v16 = vadd.f32 %v1380_v5, %v1162_v60  ;;  %v1379_v19 = vmul.f32 %v3018_v37, %v1325_v61  ;;  %v1340_v58 = vadd.f32 %v2022_v18, %v3016_v36  ;;  %v3075_v20 = vpop.eup %2210  ;;  %2234 = vrcp.f32 %v907_v8  ;;  %v1166_v0 = vpop.f32.mrf.mxu0 }
 0x19a   : > { %v908_v22 = vadd.f32 1.0, %v2209_v14  ;;  %v1334_v23 = vpop.f32.mrf.mxu1  ;;  %2236 = vtanh.f32 %v1393_v1  ;;  %v2213_v29 = vpop.eup %2212  ;;  %v1424_v37 = vsub.f32 1.0, %v2998_v54  ;;  %v1167_v33 = vadd.f32 %v3023_v41, %v1166_v0 }
 0x19b   : > { %v1395_v24 = vadd.f32 %v1379_v19, %v1157_v11  ;;  %v1382_v25 = vmul.f32 %v2197_v39, %v1340_v58  ;;  %v1335_v28 = vadd.f32 %v3016_v36, %v1334_v23  ;;  %v1969_v38 = vpop.f32.mrf.mxu0  ;;  %v2215_v40 = vpop.eup %2214  ;;  %v1003_v60 = vadd.f32 1.0, %v2207_v2 }
 0x19c   : > { %2238 = vrcp.f32 %v908_v22  ;;  %v2025_v35 = vpop.f32.mrf.mxu1  ;;  %v2217_v44 = vpop.eup %2216  ;;  %v1182_v51 = vadd.f32 %v1969_v38, %v3023_v41  ;;  %v3095_v12 = vmul.f32 %v2270_v62, %v3004_v6  ;;  %v1426_v22 = vsub.f32 1.0, %v3010_v27 }
 0x19d   : > { %2240 = vtanh.f32 %v1396_v16  ;;  %v1398_v43 = vadd.f32 %v1382_v25, %v1172_v26  ;;  %v1381_v39 = vmul.f32 %v3041_v15, %v1335_v28  ;;  %v1350_v34 = vadd.f32 %v2025_v35, %v3016_v36  ;;  %v1176_v53 = vpop.f32.mrf.mxu0  ;;  %v3091_v55 = vpop.eup %2218  ;;  %v2271_v35 = vld [vmem:[%s2678_s26 + $0x28] sm:$0xff] }
 0x19e   : > { %2242 = vrcp.f32 %v1002_v21  ;;  %v1344_v52 = vpop.f32.mrf.mxu1  ;;  %v1438_v56 = vmul.f32 %v2217_v44, %v1422_v59  ;;  %v1177_v13 = vadd.f32 %v3023_v41, %v1176_v53  ;;  %v1458_v38 = vmul.f32 %v2271_v35, %v3010_v27 }
 0x19f   : > { %2244 = vtanh.f32 %v1395_v24  ;;  %v1397_v17 = vadd.f32 %v1381_v39, %v1167_v33  ;;  %v1384_v15 = vmul.f32 %v2213_v29, %v1350_v34  ;;  %v2221_v8 = vpop.eup %2220  ;;  %v1345_v54 = vadd.f32 %v3016_v36, %v1344_v52  ;;  %v1972_v5 = vpop.f32.mrf.mxu0 }
 0x1a0   : > { %2246 = vtanh.f32 %v1398_v43  ;;  %v2028_v1 = vpop.f32.mrf.mxu1  ;;  %v2223_v61 = vpop.eup %2222  ;;  %v1470_v3 = vadd.f32 %v1454_v7, %v1438_v56  ;;  %v1437_v59 = vmul.f32 %v2221_v8, %v1421_v32  ;;  %v1192_v16 = vadd.f32 %v1972_v5, %v3023_v41  ;;  %v2272_v5 = vld [vmem:[%s2678_s26 + $0x38] sm:$0xff] }
 0x1a1   : > { %2248 = vtanh.f32 %v1397_v17  ;;  %v1400_v11 = vadd.f32 %v1384_v15, %v1182_v51  ;;  %v2225_v18 = vpop.eup %2224  ;;  %v1383_v2 = vmul.f32 %v3065_v63, %v1345_v54  ;;  %v1360_v14 = vadd.f32 %v2028_v1, %v3016_v36  ;;  %v1186_v58 = vpop.f32.mrf.mxu0 }
 0x1a2   : > { %v1354_v19 = vpop.f32.mrf.mxu1  ;;  %v2227_v21 = vpop.eup %2226  ;;  %1487 = vst [vmem:[%s3105_s16 + $0x8] sm:$0xff] %v1470_v3  ;;  %v1469_v9 = vadd.f32 %v3056_v48, %v1437_v59  ;;  %v1440_v32 = vmul.f32 %v2225_v18, %v1424_v37  ;;  %v1187_v37 = vadd.f32 %v3023_v41, %v1186_v58  ;;  %v1004_v33 = vadd.f32 1.0, %v2215_v40  ;;  %v2273_v3 = vld [vmem:[%s2678_s26 + $0x30] sm:$0xff] }
 0x1a3   : > { %2250 = vtanh.f32 %v1400_v11  ;;  %v1355_v63 = vadd.f32 %v3016_v36, %v1354_v19  ;;  %v2229_v7 = vpop.eup %2228  ;;  %v1399_v26 = vadd.f32 %v1383_v2, %v1177_v13  ;;  %v1386_v23 = vmul.f32 %v2227_v21, %v1360_v14  ;;  %v1975_v24 = vpop.f32.mrf.mxu0  ;;  %v2275_v21 = vld [vmem:[%s2678_s26 + $0x40] sm:$0xff] }
 0x1a4   : > { %2252 = vrcp.f32 %v1003_v60  ;;  %v2031_v0 = vpop.f32.mrf.mxu1  ;;  %v3111_v25 = vpop.eup %2230  ;;  %1486 = vst [vmem:[%s3105_s16] sm:$0xff] %v1469_v9  ;;  %v1472_v28 = vadd.f32 %v1456_v46, %v1440_v32  ;;  %v1439_v48 = vmul.f32 %v2229_v7, %v1423_v10  ;;  %v1428_v52 = vsub.f32 1.0, %v3036_v4 }
 0x1a5   : > { %v1385_v29 = vmul.f32 %v2223_v61, %v1355_v63  ;;  %v2233_v30 = vpop.eup %2232  ;;  %2254 = vtanh.f32 %v1399_v26  ;;  %v1402_v43 = vadd.f32 %v1386_v23, %v1192_v16  ;;  %v1196_v34 = vpop.f32.mrf.mxu0  ;;  %v1370_v27 = vadd.f32 %v2031_v0, %v3016_v36  ;;  %v2274_v16 = vld [vmem:[%s2678_s26 + $0x48] sm:$0xff] }
 0x1a6   : > { %v1364_v39 = vpop.f32.mrf.mxu1  ;;  %v2235_v44 = vpop.eup %2234  ;;  %1489 = vst [vmem:[%s3105_s16 + $0x18] sm:$0xff] %v1472_v28  ;;  %v1471_v45 = vadd.f32 %v3082_v50, %v1439_v48  ;;  %v1442_v46 = vmul.f32 %v2233_v30, %v1426_v22  ;;  %v1197_v40 = vadd.f32 %v3023_v41, %v1196_v34  ;;  %v1427_v8 = vsub.f32 1.0, %v3026_v47 }
 0x1a7   : > { %v1401_v42 = vadd.f32 %v1385_v29, %v1187_v37  ;;  %v1365_v10 = vadd.f32 %v3016_v36, %v1364_v39  ;;  %v2237_v51 = vpop.eup %2236  ;;  %2256 = vtanh.f32 %v1402_v43  ;;  %v1202_v36 = vadd.f32 %v1975_v24, %v3023_v41  ;;  %v2277_v29 = vld [vmem:[%s2678_s26 + $0x50] sm:$0xff]  ;;  %v2278_v39 = vld [vmem:[%s2678_s26 + $0x68] sm:$0xff] }
 0x1a8   : > { %1488 = vst [vmem:[%s3105_s16 + $0x10] sm:$0xff] %v1471_v45  ;;  %v1474_v56 = vadd.f32 %v1458_v38, %v1442_v46  ;;  %v1441_v50 = vmul.f32 %v2237_v51, %v1425_v49  ;;  %v1460_v6 = vmul.f32 %v2272_v5, %v3036_v4  ;;  %v1459_v59 = vmul.f32 %v2273_v3, %v3026_v47  ;;  %v2279_v46 = vld [vmem:[%s2678_s26 + $0x60] sm:$0xff] }
 0x1a9   : > { %v2239_v53 = vpop.eup %2238  ;;  %2258 = vtanh.f32 %v1401_v42  ;;  %v1387_v17 = vmul.f32 %v2235_v44, %v1365_v10  ;;  %v1430_v11 = vsub.f32 1.0, %v3061_v57  ;;  %v1462_v19 = vmul.f32 %v2274_v16, %v3061_v57  ;;  %v2276_v57 = vld [vmem:[%s2678_s26 + $0x58] sm:$0xff] }
 0x1aa   : > { %v2241_v15 = vpop.eup %2240  ;;  %2260 = vrcp.f32 %v1004_v33  ;;  %v1388_v60 = vmul.f32 %v2239_v53, %v1370_v27  ;;  %1491 = vst [vmem:[%s3105_s16 + $0x28] sm:$0xff] %v1474_v56  ;;  %v1473_v54 = vadd.f32 %v3095_v12, %v1441_v50  ;;  %v1429_v12 = vsub.f32 1.0, %v3048_v31  ;;  %v2280_v56 = vld [vmem:[%s2678_s26 + $0x70] sm:$0xff] }
 0x1ab   : > { %v2243_v62 = vpop.eup %2242  ;;  %v1444_v1 = vmul.f32 %v2241_v15, %v1428_v52  ;;  %v1403_v49 = vadd.f32 %v1387_v17, %v1197_v40  ;;  %v1461_v9 = vmul.f32 %v2275_v21, %v3048_v31  ;;  %v1432_v32 = vsub.f32 1.0, %v3091_v55  ;;  %v2281_v15 = vld [vmem:[%s2678_s26 + $0x78] sm:$0xff] }
 0x1ac   : > { %v2245_v61 = vpop.eup %2244  ;;  %v1404_v18 = vadd.f32 %v1388_v60, %v1202_v36  ;;  %1490 = vst [vmem:[%s3105_s16 + $0x20] sm:$0xff] %v1473_v54  ;;  %v1464_v0 = vmul.f32 %v2276_v57, %v3091_v55  ;;  %v1431_v24 = vsub.f32 1.0, %v3075_v20  ;;  %v1463_v37 = vmul.f32 %v2277_v29, %v3075_v20 }
 0x1ad   : > { %v2247_v41 = vpop.eup %2246  ;;  %v1476_v2 = vadd.f32 %v1460_v6, %v1444_v1  ;;  %v1443_v13 = vmul.f32 %v2245_v61, %v1427_v8  ;;  %2262 = vtanh.f32 %v1403_v49  ;;  %v1434_v30 = vsub.f32 1.0, %v2243_v62 }
 0x1ae   : > { %v2249_v14 = vpop.eup %2248  ;;  %v1446_v4 = vmul.f32 %v2247_v41, %v1430_v11  ;;  %2264 = vtanh.f32 %v1404_v18  ;;  %v1433_v35 = vsub.f32 1.0, %v3111_v25  ;;  %v1466_v34 = vmul.f32 %v2278_v39, %v2243_v62 }
 0x1af   : > { %1493 = vst [vmem:[%s3105_s16 + $0x38] sm:$0xff] %v1476_v2  ;;  %v1475_v47 = vadd.f32 %v1459_v59, %v1443_v13  ;;  %v1445_v58 = vmul.f32 %v2249_v14, %v1429_v12  ;;  %v1465_v42 = vmul.f32 %v2279_v46, %v3111_v25 }
 0x1b0   : > { %v2251_v63 = vpop.eup %2250  ;;  %v1478_v7 = vadd.f32 %v1462_v19, %v1446_v4 }
 0x1b1   : > { %v2253_v22 = vpop.eup %2252  ;;  %1492 = vst [vmem:[%s3105_s16 + $0x30] sm:$0xff] %v1475_v47  ;;  %v1477_v26 = vadd.f32 %v1461_v9, %v1445_v58  ;;  %v1448_v23 = vmul.f32 %v2251_v63, %v1432_v32 }
 0x1b2   : > { %1495 = vst [vmem:[%s3105_s16 + $0x48] sm:$0xff] %v1478_v7  ;;  %v2255_v28 = vpop.eup %2254  ;;  %v1435_v51 = vsub.f32 1.0, %v2253_v22  ;;  %v1467_v50 = vmul.f32 %v2280_v56, %v2253_v22 }
 0x1b3   : > { %1494 = vst [vmem:[%s3105_s16 + $0x40] sm:$0xff] %v1477_v26  ;;  %v1480_v31 = vadd.f32 %v1464_v0, %v1448_v23  ;;  %v1447_v48 = vmul.f32 %v2255_v28, %v1431_v24 }
 0x1b4   : > { %v2257_v33 = vpop.eup %2256 }
 0x1b5   : > { %1497 = vst [vmem:[%s3105_s16 + $0x58] sm:$0xff] %v1480_v31  ;;  %v1479_v38 = vadd.f32 %v1463_v37, %v1447_v48  ;;  %v1450_v43 = vmul.f32 %v2257_v33, %v1434_v30 }
 0x1b6   : > { %v2259_v55 = vpop.eup %2258 }
 0x1b7   : > { %v2261_v44 = vpop.eup %2260  ;;  %v1449_v45 = vmul.f32 %v2259_v55, %v1433_v35  ;;  %1496 = vst [vmem:[%s3105_s16 + $0x50] sm:$0xff] %v1479_v38  ;;  %v1482_v20 = vadd.f32 %v1466_v34, %v1450_v43 }
 0x1b8   : > { %v1436_v27 = vsub.f32 1.0, %v2261_v44  ;;  %v1468_v8 = vmul.f32 %v2281_v15, %v2261_v44 }
 0x1b9   : > { %v1481_v10 = vadd.f32 %v1465_v42, %v1449_v45  ;;  %1499 = vst [vmem:[%s3105_s16 + $0x68] sm:$0xff] %v1482_v20 }
 0x1ba   : > { %v2263_v52 = vpop.eup %2262 }
 0x1bb   : > { %v2265_v40 = vpop.eup %2264  ;;  %1498 = vst [vmem:[%s3105_s16 + $0x60] sm:$0xff] %v1481_v10  ;;  %v1451_v53 = vmul.f32 %v2263_v52, %v1435_v51 }
 0x1bc   : > { %v1452_v17 = vmul.f32 %v2265_v40, %v1436_v27  ;;  %1504 = sbr.rel (%p1811_p11) target bundleno = 466 (0x1d2), region = 156 }
 0x1bd   : > { %v1483_v60 = vadd.f32 %v1467_v50, %v1451_v53 }
 0x1be   : > { %v1484_v36 = vadd.f32 %v1468_v8, %v1452_v17 }
 0x1bf   : > { %1500 = vst [vmem:[%s3105_s16 + $0x70] sm:$0xff] %v1483_v60 }
 0x1c0   : > { %1501 = vst [vmem:[%s3105_s16 + $0x78] sm:$0xff] %v1484_v36 }
 0x1c1 LB: >> { %s1511_s18 = sadd.s32 %s2362_s17, %s2450_s23  ;;  %s1513_s20 = sadd.s32 %s2362_s17, %s2463_s12  ;;  %s2362_s17 = sphi %s2360_s17, %s1510_s17  }
 0x1c2   : >> { %s1512_s21 = sld [smem:[#allocation7 + %s1511_s18]]  ;;  %s1514_s22 = scalar_lea.vmem [#allocation3], %s1513_s20 }
 0x1c3   : >> { %s1516_s29 = scalar_lea.sflag [#allocation5], %s3200_s30 }
 0x1c7   : >> { %v1535_v25 = vld [vmem:[%s1514_s22] sm:$0x1] }
 0x1c8   : >> { %s1515_s24 = scalar_lea.vmem %s3194_s10, %s1512_s21 }
 0x1c9   : >> { %1536 = vst [vmem:[%s1515_s24] sm:$0x1] %v1535_v25 }
 0x1ca   : >> { %1562 = vsyncadd %s1516_s29, 16  ;;  %s1510_s17 = sadd.s32 1, %s2362_s17  }
 0x1cb   : >> { %p1507_p2 = scmp.ge.s32.totalorder %s1510_s17, 128  }
 0x1cd   : > { %1509 = sbr.rel (!%p1507_p2) target bundleno = 449 (0x1c1), region = 366 }
 0x1d2 PF: > { %p1849_p3 = scmp.ne.s32.totalorder %s2442_s0, 2 }
 0x1d3   : > { %s2364_s25 = smov (!%p1849_p3), 0  }
 0x1d4   : > { %1566 = sbr.rel (%p1849_p3) target bundleno = 509 (0x1fd), region = 197 }
 0x1d9 LB: >> { %s1573_s27 = sadd.s32 %s2366_s25, %s2450_s23  ;;  %s1575_s28 = sadd.s32 %s2366_s25, %s2463_s12  ;;  %s2366_s25 = sphi %s2364_s25, %s1572_s25  }
 0x1da   : >> { %s1574_s14 = sld [smem:[#allocation7 + %s1573_s27]]  ;;  %s1576_s15 = scalar_lea.vmem [#allocation3], %s1575_s28 }
 0x1db   : >> { %v1597_v62 = vld [vmem:[%s1576_s15] sm:$0x1]  ;;  %s1578_s20 = scalar_lea.sflag [#allocation5], %s3200_s30 }
 0x1e0   : >> { %s1577_s17 = scalar_lea.vmem %s3194_s10, %s1574_s14 }
 0x1e1   : >> { %1598 = vst [vmem:[%s1577_s17] sm:$0x1] %v1597_v62 }
 0x1e2   : >> { %1624 = vsyncadd %s1578_s20, 16  ;;  %s1572_s25 = sadd.s32 1, %s2366_s25  }
 0x1e3   : >> { %p1569_p4 = scmp.ge.s32.totalorder %s1572_s25, 44  }
 0x1e4   : > { %s2368_s0 = smov (%p1569_p4), 0  }
 0x1e5   : > { %1571 = sbr.rel (!%p1569_p4) target bundleno = 473 (0x1d9), region = 377 }
 0x1ea LB: >> { %s1631_s21 = scalar_lea.sflag [#allocation5], %s2460_s11  ;;  %s2370_s0 = sphi %s2368_s0, %s1630_s0  }
 0x1eb   : >> { %2336 = dma.done.wait %s1631_s21, 16 }
 0x1ec   : >> { %2337 = vsyncadd %s1631_s21, 4294967280  ;;  %s1630_s0 = sadd.s32 1, %s2370_s0  }
 0x1ed   : >> { %p1627_p5 = scmp.ge.s32.totalorder %s1630_s0, 128  }
 0x1ee   : > { %s2372_s22 = smov (%p1627_p5), 0  }
 0x1ef   : > { %1629 = sbr.rel (!%p1627_p5) target bundleno = 490 (0x1ea), region = 388 }
 0x1f4 LB: >> { %2338 = dma.done.wait %s1578_s20, 16  ;;  %s2374_s22 = sphi %s2372_s22, %s1640_s22  }
 0x1f5   : >> { %2339 = vsyncadd %s1578_s20, 4294967280  ;;  %s1640_s22 = sadd.s32 1, %s2374_s22  }
 0x1f6   : >> { %p1637_p6 = scmp.ge.s32.totalorder %s1640_s22, 44  }
 0x1f8   : > { %1639 = sbr.rel (!%p1637_p6) target bundleno = 500 (0x1f4), region = 399 }
 0x1fd PF: > { %s26_s19 = sadd.s32 1, %s2342_s19  }
 0x1fe   : > { %p23_p7 = scmp.ge.s32.totalorder %s26_s19, 4  }
 0x200   :  { %25 = sbr.rel (!%p23_p7) target bundleno = 17 (0x11), region = 410 }
 0x205   :  { %1645 = vsyncmov [#allocation4] }
 0x208   :  { %s1646_s23 = vpop.sfrf %1645 }
 0x209   :  { %p1850_p8 = scmp.ne.s32.totalorder %s1646_s23, 0 }
 0x20b   :  { %1650 = shalt.err (%p1850_p8)  }
 0x20c   :  { %1652 = vsyncmov [#allocation4 + $0x1] }
 0x20f   :  { %s1653_s30 = vpop.sfrf %1652 }
 0x210   :  { %p1851_p9 = scmp.ne.s32.totalorder %s1653_s30, 0 }
 0x212   :  { %1657 = shalt.err (%p1851_p9)  }
 0x213   :  { %1658 = vsyncmov [#allocation5] }
 0x216   :  { %s1659_s11 = vpop.sfrf %1658 }
 0x217   :  { %p1852_p10 = scmp.ne.s32.totalorder %s1659_s11, 0 }
 0x219   :  { %1663 = shalt.err (%p1852_p10)  }
 0x21a   :  { %1665 = vsyncmov [#allocation5 + $0x1] }
 0x21d   :  { %s1666_s12 = vpop.sfrf %1665 }
 0x21e   :  { %p1853_p11 = scmp.ne.s32.totalorder %s1666_s12, 0 }
 0x220   :  { %1670 = shalt.err (%p1853_p11)  }

</bundles_post_ra>
